<compile_context>
chip_gen: v7x
topology: tpu7x:2x2x1
jax: 0.10.0
libtpu: 0.0.40
codegen_flags: <defaults>
</compile_context>

<pallas_src>
import functools

import jax
import jax.numpy as jnp
from jax import lax
from jax.experimental import pallas as pl
from jax.experimental.pallas import tpu as pltpu


def _round_up(x, m):
    return (x + m - 1) // m * m


def _sepconv_kernel(x_hbm, dw_ref, pw_ref, o_ref, xbuf, sem, acc_ref,
                    *, tile_h, ksize, dilation):
    """One (batch, H-tile) grid step.

    x_hbm : (N, Hp, Wp, Cin_p)  padded NHWC input, resident in HBM (pl.ANY).
    dw_ref: (K*K, Cin_p)        depthwise taps, f32, VMEM.
    pw_ref: (Cin_p, Cout_p)     pointwise weight, bf16, VMEM.
    o_ref : (tile_h, W_pad, Cout_p) output tile (batch dim squeezed).
    xbuf  : (2, tile_h + halo, Wp, Cin_p) double-buffered input slab (VMEM).
    sem   : (2,) DMA semaphores.
    acc_ref: (tile_h, W_pad, Cin_p) f32 depthwise accumulator (VMEM).
    """
    halo = (ksize - 1) * dilation
    t_in = tile_h + halo

    n = pl.program_id(0)
    i = pl.program_id(1)
    n_h = pl.num_programs(1)

    w_pad = o_ref.shape[1]
    cout_p = o_ref.shape[2]
    cin_p = acc_ref.shape[2]

    def row_copy(img, tile, slot):
        return pltpu.make_async_copy(
            x_hbm.at[img, pl.ds(tile * tile_h, t_in)],
            xbuf.at[slot],
            sem.at[slot],
        )

    slot = i & 1

    # First row-tile of this image: nothing prefetched it, start its copy now.
    @pl.when(i == 0)
    def _():
        row_copy(n, 0, 0).start()

    # Prefetch the next row-tile of the SAME image into the other slot so its
    # DMA overlaps this tile's compute (grid axis 1 runs sequentially per core;
    # batch axis stays independent so it can be megacore-parallel).
    @pl.when(i + 1 < n_h)
    def _():
        row_copy(n, i + 1, 1 - slot).start()

    # Wait for the current tile's slab.
    row_copy(n, i, slot).wait()

    # Depthwise KxK: K*K shifted elementwise MACs on the VPU, accumulated into
    # an explicit f32 VMEM scratch (per-channel taps broadcast along lanes).
    # TODO(synk): a bf16 VPU path would roughly halve VALU cycles on v6e/v7x;
    # kept f32 (inputs are f32 and v5e has no bf16 VPU).
    for kh in range(ksize):
        for kw in range(ksize):
            patch = xbuf[slot,
                         kh * dilation: kh * dilation + tile_h,
                         kw * dilation: kw * dilation + w_pad,
                         :].astype(jnp.float32)
            tap = dw_ref[kh * ksize + kw, :].astype(jnp.float32)
            if kh == 0 and kw == 0:
                acc_ref[...] = patch * tap
            else:
                acc_ref[...] += patch * tap

    # Pointwise 1x1 on the MXU: bf16 operands, f32 accumulation. w_pad is a
    # multiple of 8, so both reshapes are layout-free (no relayout copies).
    acc2d = acc_ref[...].reshape(tile_h * w_pad, cin_p).astype(jnp.bfloat16)
    out = jnp.dot(acc2d, pw_ref[...], preferred_element_type=jnp.float32)
    o_ref[...] = out.reshape(tile_h, w_pad, cout_p).astype(o_ref.dtype)


def _pick_tile_h(h_out, wp, w_pad, cin_p, cout_p, halo, in_bytes,
                 budget_bytes=28 * 1024 * 1024):
    """Largest divisor of h_out whose double-buffered working set fits budget.

    Budget is conservative so the same tiling fits v7x (64 MiB physical VMEM)
    as well as v5e/v6e, with headroom for weights and compiler scratch.
    """
    for t in range(h_out, 0, -1):
        if h_out % t:
            continue
        need = (2 * (t + halo) * wp * cin_p * in_bytes      # input slabs (x2)
                + 2 * t * w_pad * cout_p * 4                # output blocks (x2)
                + t * w_pad * cin_p * 4)                    # f32 accumulator
        if need <= budget_bytes:
            return t
    return 1


@functools.partial(jax.jit, static_argnames=("kernel_size", "dilation", "tile_h"))
def separable_conv2d(x_nchw, dw_weight, pw_weight, *, kernel_size=3, dilation=1,
                     tile_h=None):
    """Forward pass of SeparableConv2d (stride=1, bias=False, bn=False).

    x_nchw:    (N, Cin, H, W)    input, PyTorch NCHW layout.
    dw_weight: (Cin, 1, K, K)    depthwise conv weight (PyTorch layout).
    pw_weight: (Cout, Cin, 1, 1) pointwise conv weight (PyTorch layout).
    returns:   (N, Cout, H_out, W_out)
    """
    N, Cin, H, W = x_nchw.shape
    Cout = pw_weight.shape[0]
    ksize = kernel_size

    k_eff = ksize + (ksize - 1) * (dilation - 1)
    halo = k_eff - 1
    pad_beg = halo // 2
    pad_end = halo - pad_beg

    # NHWC internally: channels on the lane axis.
    # TODO(synk): an NHWC entry point would remove this transpose (and the one
    # on the output); NCHW kept to match the PyTorch module interface.
    x = jnp.transpose(x_nchw, (0, 2, 3, 1))  # (N, H, W, Cin)

    # Faithful port of fixed_padding's reflect fallback (only reachable for
    # degenerate spatial sizes; mirrors the original's H/W mixing exactly).
    if pad_beg > H or pad_end > W:
        x = jnp.pad(x, ((0, 0), (H - 1, W - 1), (H - 1, W - 1), (0, 0)),
                    mode="reflect")
        pad_beg, pad_end = pad_beg - H + 1, pad_end - W + 1

    h_in, w_in = x.shape[1], x.shape[2]
    h_out = h_in + pad_beg + pad_end - halo
    w_out = w_in + pad_beg + pad_end - halo

    # Lane/sublane-dense padded sizes.
    cin_p = _round_up(max(Cin, 1), 128)
    cout_p = _round_up(max(Cout, 1), 128)
    w_pad = _round_up(w_out, 8)          # output width (sublane-dense)
    wp = _round_up(w_pad + halo, 8)      # padded-input width in HBM / VMEM
    hp = h_out + halo

    # One fused pad: zero conv halo + W alignment + channel padding to 128.
    x = jnp.pad(
        x,
        ((0, 0),
         (pad_beg, pad_end),
         (pad_beg, wp - w_in - pad_beg),
         (0, cin_p - Cin)))
    # x: (N, hp, wp, cin_p)

    # Depthwise taps: (Cin, 1, K, K) -> (K*K, Cin_p), f32.
    dw = jnp.transpose(dw_weight[:, 0, :, :], (1, 2, 0)).reshape(ksize * ksize, Cin)
    dw = jnp.pad(dw, ((0, 0), (0, cin_p - Cin))).astype(jnp.float32)

    # Pointwise: (Cout, Cin, 1, 1) -> (Cin_p, Cout_p), bf16 feed for the MXU.
    pw = jnp.transpose(pw_weight[:, :, 0, 0], (1, 0))
    pw = jnp.pad(pw, ((0, cin_p - Cin), (0, cout_p - Cout))).astype(jnp.bfloat16)

    in_bytes = jnp.dtype(x.dtype).itemsize
    if tile_h is None:
        tile_h = _pick_tile_h(h_out, wp, w_pad, cin_p, cout_p, halo, in_bytes)
    assert h_out % tile_h == 0, "tile_h must divide the output height"
    n_h = h_out // tile_h

    working_set = (2 * (tile_h + halo) * wp * cin_p * in_bytes
                   + 2 * tile_h * w_pad * cout_p * 4
                   + tile_h * w_pad * cin_p * 4
                   + dw.size * 4 + pw.size * 2)
    vmem_limit = int(min(max(2 * working_set, 16 * 1024 * 1024),
                         48 * 1024 * 1024))

    kernel = functools.partial(_sepconv_kernel, tile_h=tile_h, ksize=ksize,
                               dilation=dilation)

    out_padded = pl.pallas_call(
        kernel,
        out_shape=jax.ShapeDtypeStruct((N, h_out, w_pad, cout_p), x_nchw.dtype),
        grid_spec=pltpu.PrefetchScalarGridSpec(
            num_scalar_prefetch=0,
            grid=(N, n_h),
            in_specs=[
                pl.BlockSpec(memory_space=pl.ANY),                         # x in HBM
                pl.BlockSpec((ksize * ksize, cin_p), lambda n, i: (0, 0)),  # dw
                pl.BlockSpec((cin_p, cout_p), lambda n, i: (0, 0)),         # pw
            ],
            out_specs=pl.BlockSpec((None, tile_h, w_pad, cout_p),
                                   lambda n, i: (n, i, 0, 0)),
            scratch_shapes=[
                pltpu.VMEM((2, tile_h + halo, wp, cin_p), x.dtype),  # input dbl-buf
                pltpu.SemaphoreType.DMA((2,)),
                pltpu.VMEM((tile_h, w_pad, cin_p), jnp.float32),     # depthwise acc
            ],
        ),
        compiler_params=pltpu.CompilerParams(
            dimension_semantics=("parallel", "arbitrary"),
            vmem_limit_bytes=vmem_limit,
        ),
    )(x, dw, pw)

    out = out_padded[:, :, :w_out, :Cout]
    return jnp.transpose(out, (0, 3, 1, 2))  # back to NCHW


def _reference(x_nchw, dw_weight, pw_weight, kernel_size=3, dilation=1):
    """Pure-JAX reference (lax convs) for correctness checking."""
    Cin = x_nchw.shape[1]
    H, W = x_nchw.shape[2], x_nchw.shape[3]
    k_eff = kernel_size + (kernel_size - 1) * (dilation - 1)
    pad_total = k_eff - 1
    pad_beg = pad_total // 2
    pad_end = pad_total - pad_beg
    if pad_beg > H or pad_end > W:
        x_nchw = jnp.pad(x_nchw, ((0, 0), (0, 0), (H - 1, W - 1), (H - 1, W - 1)),
                         mode="reflect")
        pad_beg, pad_end = pad_beg - H + 1, pad_end - W + 1
    xp = jnp.pad(x_nchw, ((0, 0), (0, 0), (pad_beg, pad_end), (pad_beg, pad_end)))
    dwo = lax.conv_general_dilated(
        xp, dw_weight, window_strides=(1, 1), padding="VALID",
        rhs_dilation=(dilation, dilation),
        dimension_numbers=("NCHW", "OIHW", "NCHW"),
        feature_group_count=Cin)
    return lax.conv_general_dilated(
        dwo, pw_weight, window_strides=(1, 1), padding="VALID",
        dimension_numbers=("NCHW", "OIHW", "NCHW"))


if __name__ == "__main__":
    N, Cin, Cout, H, W = 2, 4, 8, 16, 16
    K = 3

    key = jax.random.PRNGKey(0)
    kx, kd, kp = jax.random.split(key, 3)
    x = jax.random.normal(kx, (N, Cin, H, W), dtype=jnp.float32)
    dw_weight = jax.random.normal(kd, (Cin, 1, K, K), dtype=jnp.float32) * 0.1
    pw_weight = jax.random.normal(kp, (Cout, Cin, 1, 1), dtype=jnp.float32) * 0.1

    # tile_h=8 -> two row tiles per image: exercises the 2-row halo handling and
    # the double-buffered input DMA even at this small size.
    out = separable_conv2d(x, dw_weight, pw_weight,
                           kernel_size=K, dilation=1, tile_h=8)
    out = jax.block_until_ready(out)

    ref = _reference(x, dw_weight, pw_weight, kernel_size=K, dilation=1)
    assert out.shape == (N, Cout, H, W), out.shape
    # bf16 feed to the MXU for the 1x1 conv -> compare at bf16-level tolerance.
    assert jnp.allclose(out, ref, atol=2e-2, rtol=2e-2), (
        float(jnp.max(jnp.abs(out - ref))))

    # TODO(synk): BatchNorm branches (bn=True) are not implemented; the module's
    # default config (bn=False) is what the kernel covers.
    print("KERNEL_OK")
</pallas_src>

<mosaic_0001>
module attributes {stable_mosaic.version = 11 : i64} {
  func.func @_sepconv_kernel(%arg0: i32, %arg1: i32, %arg2: memref<2x18x24x128xf32, #tpu.memory_space<any>>, %arg3: memref<9x128xf32, #tpu.memory_space<vmem>>, %arg4: memref<128x128xbf16, #tpu.memory_space<vmem>>, %arg5: memref<1x8x16x128xf32, #tpu.memory_space<vmem>>, %arg6: memref<2x10x24x128xf32, #tpu.memory_space<vmem>>, %arg7: memref<2x!tpu.dma_semaphore, #tpu.memory_space<semaphore_mem>>, %arg8: memref<8x16x128xf32, #tpu.memory_space<vmem>>) attributes {dimension_semantics = [#tpu.dimension_semantics<parallel>, #tpu.dimension_semantics<arbitrary>], iteration_bounds = array<i64: 2, 2>, scalar_prefetch = 0 : i64, scratch_operands = 3 : i64, tpu.core_type = #tpu.core_type<tc>, window_params = [{}, {pipeline_mode = #tpu.pipeline_mode<synchronous>, transform_indices = @transform_1, window_bounds = array<i64: 9, 128>}, {pipeline_mode = #tpu.pipeline_mode<synchronous>, transform_indices = @transform_2, window_bounds = array<i64: 128, 128>}, {transform_indices = @transform_3, window_bounds = array<i64: 1, 8, 16, 128>}]} {
    %c1_i32 = arith.constant 1 : i32
    %0 = arith.andi %arg1, %c1_i32 : i32
    %c0_i32 = arith.constant 0 : i32
    %1 = arith.cmpi eq, %arg1, %c0_i32 : i32
    %2 = arith.extui %1 : i1 to i32
    %c0_i32_0 = arith.constant 0 : i32
    %3 = arith.cmpi ne, %2, %c0_i32_0 : i32
    scf.if %3 {
      %c0_i32_104 = arith.constant 0 : i32
      %c0_i32_105 = arith.constant 0 : i32
      %c0_i32_106 = arith.constant 0 : i32
      %c0_i32_107 = arith.constant 0 : i32
      %c0_i32_108 = arith.constant 0 : i32
      %121 = tpu.memref_slice %arg2[%arg0, %c0_i32_106, %c0_i32_107, %c0_i32_108] : memref<2x18x24x128xf32, #tpu.memory_space<any>> -> memref<1x10x24x128xf32, #tpu.memory_space<any>>
      %122 = tpu.memref_squeeze %121 : memref<1x10x24x128xf32, #tpu.memory_space<any>> -> memref<10x24x128xf32, #tpu.memory_space<any>>
      %c0_i32_109 = arith.constant 0 : i32
      %c0_i32_110 = arith.constant 0 : i32
      %c0_i32_111 = arith.constant 0 : i32
      %123 = tpu.memref_slice %arg6[%c0_i32_104, %c0_i32_109, %c0_i32_110, %c0_i32_111] : memref<2x10x24x128xf32, #tpu.memory_space<vmem>> -> memref<1x10x24x128xf32, #tpu.memory_space<vmem>>
      %124 = tpu.memref_squeeze %123 : memref<1x10x24x128xf32, #tpu.memory_space<vmem>> -> memref<10x24x128xf32, #tpu.memory_space<vmem>>
      %125 = tpu.memref_slice %arg7[%c0_i32_105] : memref<2x!tpu.dma_semaphore, #tpu.memory_space<semaphore_mem>> -> memref<1x!tpu.dma_semaphore, #tpu.memory_space<semaphore_mem>>
      %126 = tpu.memref_squeeze %125 : memref<1x!tpu.dma_semaphore, #tpu.memory_space<semaphore_mem>> -> memref<!tpu.dma_semaphore, #tpu.memory_space<semaphore_mem>>
      tpu.enqueue_dma source(%122 : memref<10x24x128xf32, #tpu.memory_space<any>>) target(%124 : memref<10x24x128xf32, #tpu.memory_space<vmem>>) target_semaphore(%126 : memref<!tpu.dma_semaphore, #tpu.memory_space<semaphore_mem>>)
    } else {
    }
    %c1_i32_1 = arith.constant 1 : i32
    %4 = arith.addi %arg1, %c1_i32_1 : i32
    %c2_i32 = arith.constant 2 : i32
    %5 = arith.cmpi slt, %4, %c2_i32 : i32
    %6 = arith.extui %5 : i1 to i32
    %c0_i32_2 = arith.constant 0 : i32
    %7 = arith.cmpi ne, %6, %c0_i32_2 : i32
    scf.if %7 {
      %c1_i32_104 = arith.constant 1 : i32
      %121 = arith.addi %arg1, %c1_i32_104 : i32
      %c1_i32_105 = arith.constant 1 : i32
      %122 = arith.subi %c1_i32_105, %0 : i32
      %c8_i32_106 = arith.constant 8 : i32
      %123 = arith.muli %121, %c8_i32_106 : i32
      %c0_i32_107 = arith.constant 0 : i32
      %c0_i32_108 = arith.constant 0 : i32
      %124 = tpu.memref_slice %arg2[%arg0, %123, %c0_i32_107, %c0_i32_108] : memref<2x18x24x128xf32, #tpu.memory_space<any>> -> memref<1x10x24x128xf32, #tpu.memory_space<any>>
      %125 = tpu.memref_squeeze %124 : memref<1x10x24x128xf32, #tpu.memory_space<any>> -> memref<10x24x128xf32, #tpu.memory_space<any>>
      %c0_i32_109 = arith.constant 0 : i32
      %c0_i32_110 = arith.constant 0 : i32
      %c0_i32_111 = arith.constant 0 : i32
      %126 = tpu.memref_slice %arg6[%122, %c0_i32_109, %c0_i32_110, %c0_i32_111] : memref<2x10x24x128xf32, #tpu.memory_space<vmem>> -> memref<1x10x24x128xf32, #tpu.memory_space<vmem>>
      %127 = tpu.memref_squeeze %126 : memref<1x10x24x128xf32, #tpu.memory_space<vmem>> -> memref<10x24x128xf32, #tpu.memory_space<vmem>>
      %128 = tpu.memref_slice %arg7[%122] : memref<2x!tpu.dma_semaphore, #tpu.memory_space<semaphore_mem>> -> memref<1x!tpu.dma_semaphore, #tpu.memory_space<semaphore_mem>>
      %129 = tpu.memref_squeeze %128 : memref<1x!tpu.dma_semaphore, #tpu.memory_space<semaphore_mem>> -> memref<!tpu.dma_semaphore, #tpu.memory_space<semaphore_mem>>
      tpu.enqueue_dma source(%125 : memref<10x24x128xf32, #tpu.memory_space<any>>) target(%127 : memref<10x24x128xf32, #tpu.memory_space<vmem>>) target_semaphore(%129 : memref<!tpu.dma_semaphore, #tpu.memory_space<semaphore_mem>>)
    } else {
    }
    %c8_i32 = arith.constant 8 : i32
    %8 = arith.muli %arg1, %c8_i32 : i32
    %c0_i32_3 = arith.constant 0 : i32
    %c0_i32_4 = arith.constant 0 : i32
    %9 = tpu.memref_slice %arg2[%arg0, %8, %c0_i32_3, %c0_i32_4] : memref<2x18x24x128xf32, #tpu.memory_space<any>> -> memref<1x10x24x128xf32, #tpu.memory_space<any>>
    %10 = tpu.memref_squeeze %9 : memref<1x10x24x128xf32, #tpu.memory_space<any>> -> memref<10x24x128xf32, #tpu.memory_space<any>>
    %c0_i32_5 = arith.constant 0 : i32
    %c0_i32_6 = arith.constant 0 : i32
    %c0_i32_7 = arith.constant 0 : i32
    %11 = tpu.memref_slice %arg6[%0, %c0_i32_5, %c0_i32_6, %c0_i32_7] : memref<2x10x24x128xf32, #tpu.memory_space<vmem>> -> memref<1x10x24x128xf32, #tpu.memory_space<vmem>>
    %12 = tpu.memref_squeeze %11 : memref<1x10x24x128xf32, #tpu.memory_space<vmem>> -> memref<10x24x128xf32, #tpu.memory_space<vmem>>
    %13 = tpu.memref_slice %arg7[%0] : memref<2x!tpu.dma_semaphore, #tpu.memory_space<semaphore_mem>> -> memref<1x!tpu.dma_semaphore, #tpu.memory_space<semaphore_mem>>
    %14 = tpu.memref_squeeze %13 : memref<1x!tpu.dma_semaphore, #tpu.memory_space<semaphore_mem>> -> memref<!tpu.dma_semaphore, #tpu.memory_space<semaphore_mem>>
    tpu.wait_dma2 semaphore(%14 : memref<!tpu.dma_semaphore, #tpu.memory_space<semaphore_mem>>) src(%10 : memref<10x24x128xf32, #tpu.memory_space<any>>) dst(%12 : memref<10x24x128xf32, #tpu.memory_space<vmem>>)
    %15 = arith.index_cast %0 : i32 to index
    %c0 = arith.constant 0 : index
    %c0_8 = arith.constant 0 : index
    %c0_9 = arith.constant 0 : index
    %16 = vector.load %arg6[%15, %c0, %c0_8, %c0_9] : memref<2x10x24x128xf32, #tpu.memory_space<vmem>>, vector<1x8x16x128xf32>
    %17 = vector.shape_cast %16 : vector<1x8x16x128xf32> to vector<8x16x128xf32>
    %c0_10 = arith.constant 0 : index
    %c0_11 = arith.constant 0 : index
    %18 = vector.load %arg3[%c0_10, %c0_11] : memref<9x128xf32, #tpu.memory_space<vmem>>, vector<1x128xf32>
    %19 = vector.shape_cast %18 : vector<1x128xf32> to vector<128xf32>
    %20 = vector.shape_cast %19 : vector<128xf32> to vector<1x1x128xf32>
    %21 = vector.broadcast %20 : vector<1x1x128xf32> to vector<8x16x128xf32>
    %22 = arith.mulf %17, %21 : vector<8x16x128xf32>
    %c0_12 = arith.constant 0 : index
    %c0_13 = arith.constant 0 : index
    %c0_14 = arith.constant 0 : index
    %23 = vector.load %arg8[%c0_12, %c0_13, %c0_14] : memref<8x16x128xf32, #tpu.memory_space<vmem>>, vector<8x16x128xf32>
    tpu.vector_store %arg8[%c0_12, %c0_13, %c0_14], %22 {strides = array<i32>} : memref<8x16x128xf32, #tpu.memory_space<vmem>>, vector<8x16x128xf32>,
    %24 = arith.index_cast %0 : i32 to index
    %c0_15 = arith.constant 0 : index
    %c1 = arith.constant 1 : index
    %c0_16 = arith.constant 0 : index
    %25 = vector.load %arg6[%24, %c0_15, %c1, %c0_16] : memref<2x10x24x128xf32, #tpu.memory_space<vmem>>, vector<1x8x16x128xf32>
    %26 = vector.shape_cast %25 : vector<1x8x16x128xf32> to vector<8x16x128xf32>
    %c1_17 = arith.constant 1 : index
    %c0_18 = arith.constant 0 : index
    %27 = vector.load %arg3[%c1_17, %c0_18] : memref<9x128xf32, #tpu.memory_space<vmem>>, vector<1x128xf32>
    %28 = vector.shape_cast %27 : vector<1x128xf32> to vector<128xf32>
    %c0_19 = arith.constant 0 : index
    %c0_20 = arith.constant 0 : index
    %c0_21 = arith.constant 0 : index
    %29 = vector.load %arg8[%c0_19, %c0_20, %c0_21] : memref<8x16x128xf32, #tpu.memory_space<vmem>>, vector<8x16x128xf32>
    %30 = vector.shape_cast %28 : vector<128xf32> to vector<1x1x128xf32>
    %31 = vector.broadcast %30 : vector<1x1x128xf32> to vector<8x16x128xf32>
    %32 = arith.mulf %26, %31 : vector<8x16x128xf32>
    %33 = arith.addf %29, %32 : vector<8x16x128xf32>
    %c0_22 = arith.constant 0 : index
    %c0_23 = arith.constant 0 : index
    %c0_24 = arith.constant 0 : index
    %34 = vector.load %arg8[%c0_22, %c0_23, %c0_24] : memref<8x16x128xf32, #tpu.memory_space<vmem>>, vector<8x16x128xf32>
    tpu.vector_store %arg8[%c0_22, %c0_23, %c0_24], %33 {strides = array<i32>} : memref<8x16x128xf32, #tpu.memory_space<vmem>>, vector<8x16x128xf32>,
    %35 = arith.index_cast %0 : i32 to index
    %c0_25 = arith.constant 0 : index
    %c2 = arith.constant 2 : index
    %c0_26 = arith.constant 0 : index
    %36 = vector.load %arg6[%35, %c0_25, %c2, %c0_26] : memref<2x10x24x128xf32, #tpu.memory_space<vmem>>, vector<1x8x16x128xf32>
    %37 = vector.shape_cast %36 : vector<1x8x16x128xf32> to vector<8x16x128xf32>
    %c2_27 = arith.constant 2 : index
    %c0_28 = arith.constant 0 : index
    %38 = vector.load %arg3[%c2_27, %c0_28] : memref<9x128xf32, #tpu.memory_space<vmem>>, vector<1x128xf32>
    %39 = vector.shape_cast %38 : vector<1x128xf32> to vector<128xf32>
    %c0_29 = arith.constant 0 : index
    %c0_30 = arith.constant 0 : index
    %c0_31 = arith.constant 0 : index
    %40 = vector.load %arg8[%c0_29, %c0_30, %c0_31] : memref<8x16x128xf32, #tpu.memory_space<vmem>>, vector<8x16x128xf32>
    %41 = vector.shape_cast %39 : vector<128xf32> to vector<1x1x128xf32>
    %42 = vector.broadcast %41 : vector<1x1x128xf32> to vector<8x16x128xf32>
    %43 = arith.mulf %37, %42 : vector<8x16x128xf32>
    %44 = arith.addf %40, %43 : vector<8x16x128xf32>
    %c0_32 = arith.constant 0 : index
    %c0_33 = arith.constant 0 : index
    %c0_34 = arith.constant 0 : index
    %45 = vector.load %arg8[%c0_32, %c0_33, %c0_34] : memref<8x16x128xf32, #tpu.memory_space<vmem>>, vector<8x16x128xf32>
    tpu.vector_store %arg8[%c0_32, %c0_33, %c0_34], %44 {strides = array<i32>} : memref<8x16x128xf32, #tpu.memory_space<vmem>>, vector<8x16x128xf32>,
    %46 = arith.index_cast %0 : i32 to index
    %c1_35 = arith.constant 1 : index
    %c0_36 = arith.constant 0 : index
    %c0_37 = arith.constant 0 : index
    %47 = vector.load %arg6[%46, %c1_35, %c0_36, %c0_37] : memref<2x10x24x128xf32, #tpu.memory_space<vmem>>, vector<1x8x16x128xf32>
    %48 = vector.shape_cast %47 : vector<1x8x16x128xf32> to vector<8x16x128xf32>
    %c3 = arith.constant 3 : index
    %c0_38 = arith.constant 0 : index
    %49 = vector.load %arg3[%c3, %c0_38] : memref<9x128xf32, #tpu.memory_space<vmem>>, vector<1x128xf32>
    %50 = vector.shape_cast %49 : vector<1x128xf32> to vector<128xf32>
    %c0_39 = arith.constant 0 : index
    %c0_40 = arith.constant 0 : index
    %c0_41 = arith.constant 0 : index
    %51 = vector.load %arg8[%c0_39, %c0_40, %c0_41] : memref<8x16x128xf32, #tpu.memory_space<vmem>>, vector<8x16x128xf32>
    %52 = vector.shape_cast %50 : vector<128xf32> to vector<1x1x128xf32>
    %53 = vector.broadcast %52 : vector<1x1x128xf32> to vector<8x16x128xf32>
    %54 = arith.mulf %48, %53 : vector<8x16x128xf32>
    %55 = arith.addf %51, %54 : vector<8x16x128xf32>
    %c0_42 = arith.constant 0 : index
    %c0_43 = arith.constant 0 : index
    %c0_44 = arith.constant 0 : index
    %56 = vector.load %arg8[%c0_42, %c0_43, %c0_44] : memref<8x16x128xf32, #tpu.memory_space<vmem>>, vector<8x16x128xf32>
    tpu.vector_store %arg8[%c0_42, %c0_43, %c0_44], %55 {strides = array<i32>} : memref<8x16x128xf32, #tpu.memory_space<vmem>>, vector<8x16x128xf32>,
    %57 = arith.index_cast %0 : i32 to index
    %c1_45 = arith.constant 1 : index
    %c1_46 = arith.constant 1 : index
    %c0_47 = arith.constant 0 : index
    %58 = vector.load %arg6[%57, %c1_45, %c1_46, %c0_47] : memref<2x10x24x128xf32, #tpu.memory_space<vmem>>, vector<1x8x16x128xf32>
    %59 = vector.shape_cast %58 : vector<1x8x16x128xf32> to vector<8x16x128xf32>
    %c4 = arith.constant 4 : index
    %c0_48 = arith.constant 0 : index
    %60 = vector.load %arg3[%c4, %c0_48] : memref<9x128xf32, #tpu.memory_space<vmem>>, vector<1x128xf32>
    %61 = vector.shape_cast %60 : vector<1x128xf32> to vector<128xf32>
    %c0_49 = arith.constant 0 : index
    %c0_50 = arith.constant 0 : index
    %c0_51 = arith.constant 0 : index
    %62 = vector.load %arg8[%c0_49, %c0_50, %c0_51] : memref<8x16x128xf32, #tpu.memory_space<vmem>>, vector<8x16x128xf32>
    %63 = vector.shape_cast %61 : vector<128xf32> to vector<1x1x128xf32>
    %64 = vector.broadcast %63 : vector<1x1x128xf32> to vector<8x16x128xf32>
    %65 = arith.mulf %59, %64 : vector<8x16x128xf32>
    %66 = arith.addf %62, %65 : vector<8x16x128xf32>
    %c0_52 = arith.constant 0 : index
    %c0_53 = arith.constant 0 : index
    %c0_54 = arith.constant 0 : index
    %67 = vector.load %arg8[%c0_52, %c0_53, %c0_54] : memref<8x16x128xf32, #tpu.memory_space<vmem>>, vector<8x16x128xf32>
    tpu.vector_store %arg8[%c0_52, %c0_53, %c0_54], %66 {strides = array<i32>} : memref<8x16x128xf32, #tpu.memory_space<vmem>>, vector<8x16x128xf32>,
    %68 = arith.index_cast %0 : i32 to index
    %c1_55 = arith.constant 1 : index
    %c2_56 = arith.constant 2 : index
    %c0_57 = arith.constant 0 : index
    %69 = vector.load %arg6[%68, %c1_55, %c2_56, %c0_57] : memref<2x10x24x128xf32, #tpu.memory_space<vmem>>, vector<1x8x16x128xf32>
    %70 = vector.shape_cast %69 : vector<1x8x16x128xf32> to vector<8x16x128xf32>
    %c5 = arith.constant 5 : index
    %c0_58 = arith.constant 0 : index
    %71 = vector.load %arg3[%c5, %c0_58] : memref<9x128xf32, #tpu.memory_space<vmem>>, vector<1x128xf32>
    %72 = vector.shape_cast %71 : vector<1x128xf32> to vector<128xf32>
    %c0_59 = arith.constant 0 : index
    %c0_60 = arith.constant 0 : index
    %c0_61 = arith.constant 0 : index
    %73 = vector.load %arg8[%c0_59, %c0_60, %c0_61] : memref<8x16x128xf32, #tpu.memory_space<vmem>>, vector<8x16x128xf32>
    %74 = vector.shape_cast %72 : vector<128xf32> to vector<1x1x128xf32>
    %75 = vector.broadcast %74 : vector<1x1x128xf32> to vector<8x16x128xf32>
    %76 = arith.mulf %70, %75 : vector<8x16x128xf32>
    %77 = arith.addf %73, %76 : vector<8x16x128xf32>
    %c0_62 = arith.constant 0 : index
    %c0_63 = arith.constant 0 : index
    %c0_64 = arith.constant 0 : index
    %78 = vector.load %arg8[%c0_62, %c0_63, %c0_64] : memref<8x16x128xf32, #tpu.memory_space<vmem>>, vector<8x16x128xf32>
    tpu.vector_store %arg8[%c0_62, %c0_63, %c0_64], %77 {strides = array<i32>} : memref<8x16x128xf32, #tpu.memory_space<vmem>>, vector<8x16x128xf32>,
    %79 = arith.index_cast %0 : i32 to index
    %c2_65 = arith.constant 2 : index
    %c0_66 = arith.constant 0 : index
    %c0_67 = arith.constant 0 : index
    %80 = vector.load %arg6[%79, %c2_65, %c0_66, %c0_67] : memref<2x10x24x128xf32, #tpu.memory_space<vmem>>, vector<1x8x16x128xf32>
    %81 = vector.shape_cast %80 : vector<1x8x16x128xf32> to vector<8x16x128xf32>
    %c6 = arith.constant 6 : index
    %c0_68 = arith.constant 0 : index
    %82 = vector.load %arg3[%c6, %c0_68] : memref<9x128xf32, #tpu.memory_space<vmem>>, vector<1x128xf32>
    %83 = vector.shape_cast %82 : vector<1x128xf32> to vector<128xf32>
    %c0_69 = arith.constant 0 : index
    %c0_70 = arith.constant 0 : index
    %c0_71 = arith.constant 0 : index
    %84 = vector.load %arg8[%c0_69, %c0_70, %c0_71] : memref<8x16x128xf32, #tpu.memory_space<vmem>>, vector<8x16x128xf32>
    %85 = vector.shape_cast %83 : vector<128xf32> to vector<1x1x128xf32>
    %86 = vector.broadcast %85 : vector<1x1x128xf32> to vector<8x16x128xf32>
    %87 = arith.mulf %81, %86 : vector<8x16x128xf32>
    %88 = arith.addf %84, %87 : vector<8x16x128xf32>
    %c0_72 = arith.constant 0 : index
    %c0_73 = arith.constant 0 : index
    %c0_74 = arith.constant 0 : index
    %89 = vector.load %arg8[%c0_72, %c0_73, %c0_74] : memref<8x16x128xf32, #tpu.memory_space<vmem>>, vector<8x16x128xf32>
    tpu.vector_store %arg8[%c0_72, %c0_73, %c0_74], %88 {strides = array<i32>} : memref<8x16x128xf32, #tpu.memory_space<vmem>>, vector<8x16x128xf32>,
    %90 = arith.index_cast %0 : i32 to index
    %c2_75 = arith.constant 2 : index
    %c1_76 = arith.constant 1 : index
    %c0_77 = arith.constant 0 : index
    %91 = vector.load %arg6[%90, %c2_75, %c1_76, %c0_77] : memref<2x10x24x128xf32, #tpu.memory_space<vmem>>, vector<1x8x16x128xf32>
    %92 = vector.shape_cast %91 : vector<1x8x16x128xf32> to vector<8x16x128xf32>
    %c7 = arith.constant 7 : index
    %c0_78 = arith.constant 0 : index
    %93 = vector.load %arg3[%c7, %c0_78] : memref<9x128xf32, #tpu.memory_space<vmem>>, vector<1x128xf32>
    %94 = vector.shape_cast %93 : vector<1x128xf32> to vector<128xf32>
    %c0_79 = arith.constant 0 : index
    %c0_80 = arith.constant 0 : index
    %c0_81 = arith.constant 0 : index
    %95 = vector.load %arg8[%c0_79, %c0_80, %c0_81] : memref<8x16x128xf32, #tpu.memory_space<vmem>>, vector<8x16x128xf32>
    %96 = vector.shape_cast %94 : vector<128xf32> to vector<1x1x128xf32>
    %97 = vector.broadcast %96 : vector<1x1x128xf32> to vector<8x16x128xf32>
    %98 = arith.mulf %92, %97 : vector<8x16x128xf32>
    %99 = arith.addf %95, %98 : vector<8x16x128xf32>
    %c0_82 = arith.constant 0 : index
    %c0_83 = arith.constant 0 : index
    %c0_84 = arith.constant 0 : index
    %100 = vector.load %arg8[%c0_82, %c0_83, %c0_84] : memref<8x16x128xf32, #tpu.memory_space<vmem>>, vector<8x16x128xf32>
    tpu.vector_store %arg8[%c0_82, %c0_83, %c0_84], %99 {strides = array<i32>} : memref<8x16x128xf32, #tpu.memory_space<vmem>>, vector<8x16x128xf32>,
    %101 = arith.index_cast %0 : i32 to index
    %c2_85 = arith.constant 2 : index
    %c2_86 = arith.constant 2 : index
    %c0_87 = arith.constant 0 : index
    %102 = vector.load %arg6[%101, %c2_85, %c2_86, %c0_87] : memref<2x10x24x128xf32, #tpu.memory_space<vmem>>, vector<1x8x16x128xf32>
    %103 = vector.shape_cast %102 : vector<1x8x16x128xf32> to vector<8x16x128xf32>
    %c8 = arith.constant 8 : index
    %c0_88 = arith.constant 0 : index
    %104 = vector.load %arg3[%c8, %c0_88] : memref<9x128xf32, #tpu.memory_space<vmem>>, vector<1x128xf32>
    %105 = vector.shape_cast %104 : vector<1x128xf32> to vector<128xf32>
    %c0_89 = arith.constant 0 : index
    %c0_90 = arith.constant 0 : index
    %c0_91 = arith.constant 0 : index
    %106 = vector.load %arg8[%c0_89, %c0_90, %c0_91] : memref<8x16x128xf32, #tpu.memory_space<vmem>>, vector<8x16x128xf32>
    %107 = vector.shape_cast %105 : vector<128xf32> to vector<1x1x128xf32>
    %108 = vector.broadcast %107 : vector<1x1x128xf32> to vector<8x16x128xf32>
    %109 = arith.mulf %103, %108 : vector<8x16x128xf32>
    %110 = arith.addf %106, %109 : vector<8x16x128xf32>
    %c0_92 = arith.constant 0 : index
    %c0_93 = arith.constant 0 : index
    %c0_94 = arith.constant 0 : index
    %111 = vector.load %arg8[%c0_92, %c0_93, %c0_94] : memref<8x16x128xf32, #tpu.memory_space<vmem>>, vector<8x16x128xf32>
    tpu.vector_store %arg8[%c0_92, %c0_93, %c0_94], %110 {strides = array<i32>} : memref<8x16x128xf32, #tpu.memory_space<vmem>>, vector<8x16x128xf32>,
    %c0_95 = arith.constant 0 : index
    %c0_96 = arith.constant 0 : index
    %c0_97 = arith.constant 0 : index
    %112 = vector.load %arg8[%c0_95, %c0_96, %c0_97] : memref<8x16x128xf32, #tpu.memory_space<vmem>>, vector<8x16x128xf32>
    %113 = vector.shape_cast %112 : vector<8x16x128xf32> to vector<128x128xf32>
    %114 = arith.truncf %113 : vector<128x128xf32> to vector<128x128xbf16>
    %c0_98 = arith.constant 0 : index
    %c0_99 = arith.constant 0 : index
    %115 = vector.load %arg4[%c0_98, %c0_99] : memref<128x128xbf16, #tpu.memory_space<vmem>>, vector<128x128xbf16>
    %cst = arith.constant dense<0.000000e+00> : vector<128x128xf32>
    %116 = tpu.matmul %114, %115, %cst {dimension_numbers = #tpu.dot_dimension_numbers<[1], [0], [0], [1], [0, 0, 1, 1], [], []>} : vector<128x128xbf16>, vector<128x128xbf16>, vector<128x128xf32> -> vector<128x128xf32>
    %117 = vector.shape_cast %116 : vector<128x128xf32> to vector<8x16x128xf32>
    %c0_100 = arith.constant 0 : index
    %c0_101 = arith.constant 0 : index
    %c0_102 = arith.constant 0 : index
    %c0_103 = arith.constant 0 : index
    %118 = vector.load %arg5[%c0_100, %c0_101, %c0_102, %c0_103] : memref<1x8x16x128xf32, #tpu.memory_space<vmem>>, vector<1x8x16x128xf32>
    %119 = vector.shape_cast %118 : vector<1x8x16x128xf32> to vector<8x16x128xf32>
    %120 = vector.shape_cast %117 : vector<8x16x128xf32> to vector<1x8x16x128xf32>
    tpu.vector_store %arg5[%c0_100, %c0_101, %c0_102, %c0_103], %120 {strides = array<i32>} : memref<1x8x16x128xf32, #tpu.memory_space<vmem>>, vector<1x8x16x128xf32>,
    return
  }
  func.func @transform_1(%arg0: i32, %arg1: i32) -> (i32, i32) {
    %c0_i32 = arith.constant 0 : i32
    %c0_i32_0 = arith.constant 0 : i32
    %c0_i32_1 = arith.constant 0 : i32
    return %c0_i32, %c0_i32_0 : i32, i32
  }
  func.func @transform_2(%arg0: i32, %arg1: i32) -> (i32, i32) {
    %c0_i32 = arith.constant 0 : i32
    %c0_i32_0 = arith.constant 0 : i32
    %c0_i32_1 = arith.constant 0 : i32
    return %c0_i32, %c0_i32_0 : i32, i32
  }
  func.func @transform_3(%arg0: i32, %arg1: i32) -> (i32, i32, i32, i32) {
    %c0_i32 = arith.constant 0 : i32
    %c0_i32_0 = arith.constant 0 : i32
    %c0_i32_1 = arith.constant 0 : i32
    return %arg0, %arg1, %c0_i32, %c0_i32_0 : i32, i32, i32, i32
  }
}

</mosaic_0001>

<bundles_post_ra>
// kernel: separable_conv2d.1
= control target key start
LH: loop header
LB: loop body
LE: loop exit
PB: predicated region body
PF: predicated region fallthrough
CT: control target
= control target key end

     0   :  { %s1775_s12 = smov 0   ;;  %s1777_s13 = smov 0   ;;  %s2467_s0 = inlined_call_operand.vmem [shape: f32[2,18,24,128], index: 0, kind: input, shape index: {}]   ;;  %s2468_s1 = inlined_call_operand.vmem [shape: f32[9,128], index: 1, kind: input, shape index: {}]   ;;  %s2469_s2 = inlined_call_operand.vmem [shape: bf16[128,128], index: 2, kind: input, shape index: {}]   ;;  %s2470_s3 = inlined_call_operand.vmem [shape: f32[2,16,16,128], index: 3, kind: output, shape index: {}]  }
   0x1   :  { %s1779_s14 = smov 0   ;;  %s1781_s15 = smov 0  }
   0x2   :  { %s1783_s16 = smov 0  }
   0x3 LB: > { %s22_s17 = sadd.s32 1, %s1745_s14  ;;  %s25_s18 = sadd.s32 1, %s1749_s15  ;;  %s1753_s16 = sphi %s1783_s16, %s13_s16   ;;  %s1749_s15 = sphi %s1781_s15, %s2483_s15   ;;  %s1745_s14 = sphi %s1779_s14, %s2482_s14   ;;  %s1741_s13 = sphi %s1777_s13, %s2481_s13   ;;  %s1737_s12 = sphi %s1775_s12, %s2480_s12  }
   0x4   : > { %p23_p0 = scmp.ge.s32.totalorder %s22_s17, 2  ;;  %p1446_p1 = scmp.ge.s32.totalorder %s1753_s16, 1 }
   0x5   : > { %p117_p2 = scmp.lt.s32.totalorder %s1753_s16, 5 }
   0x6   : > { %s2485_s17 = smov (%p23_p0, %s22_s17), 0  ;;  %s2487_s18 = smov (!%p23_p0, %s25_s18), %s1749_s15 }
   0x7   : > { %p118_p3 = pnand %p1446_p1, %p117_p2  ;;  %p27_p4 = scmp.ge.s32.totalorder %s2487_s18, 2 }
   0x9   : > { %s2489_s18 = smov (%p27_p4, %s2487_s18), 0  ;;  %121 = sbr.rel (%p118_p3) target bundleno = 373 (0x175), region = 28 }
  0x10   : > { %s1447_s19 = sshll.u32 %s1737_s12, 3  ;;  %p140_p5 = scmp.lt.s32.totalorder %s1741_s13, 1 }
  0x11   : > { %p142_p6 = scmp.lt.s32.totalorder %s1447_s19, 15  ;;  %s1812_s20 = sand.u32 1, %s1737_s12 }
  0x12   : > { %s141_s21 = scalar_select %p140_p5, %s1741_s13, 1 }
  0x13   : > { %s2491_s19 = smov (!%p142_p6, %s1447_s19), 15  ;;  %p1451_p7 = scmp.ne.s32.totalorder %s1737_s12, 0 }
  0x14   : > { %s1449_s22 = sshll.u32 %s141_s21, 5  ;;  %s1448_s23 = sshll.u32 %s2491_s19, 1 }
  0x15   : > { %s146_s24 = sadd.s32 %s1449_s22, %s1448_s23  ;;  %155 = sbr.rel (%p1451_p7) target bundleno = 42 (0x2a), region = 32 }
  0x16   : > { %s1450_s25 = sshll.u32 %s146_s24, 3  ;;  %s156_s29 = smul.u32 (!%p1451_p7), 432, %s1741_s13 }
  0x17   : > { %s1818_s28 = scalar_lea.vmem %s2470_s3, %s1450_s25 }
  0x18   : > { %s1825_s5 = scalar_lea.vmem (!%p1451_p7), %s2467_s0, %s156_s29 }
  0x19   : > { %v190_v0 = vld [vmem:[%s1825_s5] sm:$0xff] (!%p1451_p7)  ;;  %v192_v1 = vld [vmem:[%s1825_s5 + $0x8] sm:$0xff] (!%p1451_p7)  ;;  %v194_v2 = vld [vmem:[%s1825_s5 + $0x10] sm:$0xff] (!%p1451_p7) }
  0x1a   : > { %191 = vst [vmem:[#allocation2] sm:$0xff] (!%p1451_p7), %v190_v0  ;;  %193 = vst [vmem:[#allocation2 + $0x8] sm:$0xff] (!%p1451_p7), %v192_v1  ;;  %v196_v3 = vld [vmem:[%s1825_s5 + $0x18] sm:$0xff] (!%p1451_p7)  ;;  %v198_v4 = vld [vmem:[%s1825_s5 + $0x20] sm:$0xff] (!%p1451_p7) }
  0x1b   : > { %195 = vst [vmem:[#allocation2 + $0x10] sm:$0xff] (!%p1451_p7), %v194_v2  ;;  %v200_v5 = vld [vmem:[%s1825_s5 + $0x28] sm:$0xff] (!%p1451_p7)  ;;  %197 = vst [vmem:[#allocation2 + $0x18] sm:$0xff] (!%p1451_p7), %v196_v3  ;;  %v202_v6 = vld [vmem:[%s1825_s5 + $0x30] sm:$0xff] (!%p1451_p7) }
  0x1c   : > { %199 = vst [vmem:[#allocation2 + $0x20] sm:$0xff] %v198_v4  ;;  %201 = vst [vmem:[#allocation2 + $0x28] sm:$0xff] %v200_v5  ;;  %v204_v7 = vld [vmem:[%s1825_s5 + $0x38] sm:$0xff]  ;;  %v206_v8 = vld [vmem:[%s1825_s5 + $0x40] sm:$0xff] }
  0x1d   : > { %203 = vst [vmem:[#allocation2 + $0x30] sm:$0xff] %v202_v6  ;;  %205 = vst [vmem:[#allocation2 + $0x38] sm:$0xff] %v204_v7  ;;  %v208_v9 = vld [vmem:[%s1825_s5 + $0x48] sm:$0xff]  ;;  %v210_v10 = vld [vmem:[%s1825_s5 + $0x50] sm:$0xff] }
  0x1e   : > { %207 = vst [vmem:[#allocation2 + $0x40] sm:$0xff] %v206_v8  ;;  %v212_v11 = vld [vmem:[%s1825_s5 + $0x58] sm:$0xff]  ;;  %209 = vst [vmem:[#allocation2 + $0x48] sm:$0xff] %v208_v9  ;;  %v214_v12 = vld [vmem:[%s1825_s5 + $0x60] sm:$0xff] }
  0x1f   : > { %211 = vst [vmem:[#allocation2 + $0x50] sm:$0xff] %v210_v10  ;;  %213 = vst [vmem:[#allocation2 + $0x58] sm:$0xff] %v212_v11  ;;  %v216_v13 = vld [vmem:[%s1825_s5 + $0x68] sm:$0xff]  ;;  %v218_v14 = vld [vmem:[%s1825_s5 + $0x70] sm:$0xff] }
  0x20   : > { %215 = vst [vmem:[#allocation2 + $0x60] sm:$0xff] %v214_v12  ;;  %217 = vst [vmem:[#allocation2 + $0x68] sm:$0xff] %v216_v13  ;;  %v220_v15 = vld [vmem:[%s1825_s5 + $0x78] sm:$0xff]  ;;  %v222_v16 = vld [vmem:[%s1825_s5 + $0x80] sm:$0xff] }
  0x21   : > { %219 = vst [vmem:[#allocation2 + $0x70] sm:$0xff] %v218_v14  ;;  %v224_v17 = vld [vmem:[%s1825_s5 + $0x88] sm:$0xff]  ;;  %221 = vst [vmem:[#allocation2 + $0x78] sm:$0xff] %v220_v15  ;;  %v226_v18 = vld [vmem:[%s1825_s5 + $0x90] sm:$0xff] }
  0x22   : > { %223 = vst [vmem:[#allocation2 + $0x80] sm:$0xff] %v222_v16  ;;  %225 = vst [vmem:[#allocation2 + $0x88] sm:$0xff] %v224_v17  ;;  %v228_v19 = vld [vmem:[%s1825_s5 + $0x98] sm:$0xff]  ;;  %v230_v20 = vld [vmem:[%s1825_s5 + $0xa0] sm:$0xff] }
  0x23   : > { %227 = vst [vmem:[#allocation2 + $0x90] sm:$0xff] %v226_v18  ;;  %229 = vst [vmem:[#allocation2 + $0x98] sm:$0xff] %v228_v19  ;;  %v232_v21 = vld [vmem:[%s1825_s5 + $0xa8] sm:$0xff]  ;;  %v234_v22 = vld [vmem:[%s1825_s5 + $0xb0] sm:$0xff] }
  0x24   : > { %231 = vst [vmem:[#allocation2 + $0xa0] sm:$0xff] %v230_v20  ;;  %v236_v23 = vld [vmem:[%s1825_s5 + $0xb8] sm:$0xff]  ;;  %233 = vst [vmem:[#allocation2 + $0xa8] sm:$0xff] %v232_v21  ;;  %v238_v24 = vld [vmem:[%s1825_s5 + $0xc0] sm:$0xff] }
  0x25   : > { %235 = vst [vmem:[#allocation2 + $0xb0] sm:$0xff] %v234_v22  ;;  %237 = vst [vmem:[#allocation2 + $0xb8] sm:$0xff] %v236_v23  ;;  %v240_v25 = vld [vmem:[%s1825_s5 + $0xc8] sm:$0xff]  ;;  %v242_v26 = vld [vmem:[%s1825_s5 + $0xd0] sm:$0xff] }
  0x26   : > { %239 = vst [vmem:[#allocation2 + $0xc0] sm:$0xff] %v238_v24  ;;  %241 = vst [vmem:[#allocation2 + $0xc8] sm:$0xff] %v240_v25  ;;  %v244_v27 = vld [vmem:[%s1825_s5 + $0xd8] sm:$0xff]  ;;  %v246_v28 = vld [vmem:[%s1825_s5 + $0xe0] sm:$0xff] }
  0x27   : > { %243 = vst [vmem:[#allocation2 + $0xd0] sm:$0xff] %v242_v26  ;;  %v248_v29 = vld [vmem:[%s1825_s5 + $0xe8] sm:$0xff]  ;;  %245 = vst [vmem:[#allocation2 + $0xd8] sm:$0xff] %v244_v27 }
  0x28   : > { %247 = vst [vmem:[#allocation2 + $0xe0] sm:$0xff] %v246_v28  ;;  %249 = vst [vmem:[#allocation2 + $0xe8] sm:$0xff] %v248_v29 }
  0x29   : > { %257 = vsyncadd [#allocation3], 3840 }
  0x2a PF: > { %s258_s6 = sadd.s32 1, %s1737_s12 }
  0x2b   : > { %p1452_p8 = scmp.ge.s32.totalorder %s258_s6, 2 }
  0x2c   : > { %s263_s7 = ssub.s32 (!%p1452_p8), 1, %s1812_s20  ;;  %s1374_s8 = smul.u32 (!%p1452_p8), 192, %s1737_s12 }
  0x2d   : > { %262 = sbr.rel (%p1452_p8) target bundleno = 67 (0x43), region = 70 }
  0x2e   : > { %s1375_s9 = smul.u32 (!%p1452_p8), 432, %s1741_s13  ;;  %s271_s13 = scalar_lea.sflag (!%p1452_p8), [#allocation3], %s263_s7 }
  0x2f   : > { %s269_s10 = smul.u32 (!%p1452_p8), 240, %s263_s7 }
  0x30   : > { %s1376_s11 = sadd.s32 (!%p1452_p8), %s1375_s9, %s1374_s8 }
  0x31   : > { %s1866_s22 = scalar_lea.vmem (!%p1452_p8), %s2467_s0, %s1376_s11  ;;  %s1871_s12 = scalar_lea.vmem (!%p1452_p8), [#allocation2], %s269_s10 }
  0x32   : > { %v1453_v30 = vld [vmem:[%s1866_s22 + $0xc0] sm:$0xff] (!%p1452_p8)  ;;  %v1454_v31 = vld [vmem:[%s1866_s22 + $0xc8] sm:$0xff] (!%p1452_p8)  ;;  %v1455_v32 = vld [vmem:[%s1866_s22 + $0xd0] sm:$0xff] (!%p1452_p8) }
  0x33   : > { %305 = vst [vmem:[%s1871_s12] sm:$0xff] (!%p1452_p8), %v1453_v30  ;;  %307 = vst [vmem:[%s1871_s12 + $0x8] sm:$0xff] (!%p1452_p8), %v1454_v31  ;;  %v1456_v33 = vld [vmem:[%s1866_s22 + $0xd8] sm:$0xff] (!%p1452_p8)  ;;  %v1457_v34 = vld [vmem:[%s1866_s22 + $0xe0] sm:$0xff] (!%p1452_p8) }
  0x34   : > { %309 = vst [vmem:[%s1871_s12 + $0x10] sm:$0xff] %v1455_v32  ;;  %v1458_v35 = vld [vmem:[%s1866_s22 + $0xe8] sm:$0xff]  ;;  %311 = vst [vmem:[%s1871_s12 + $0x18] sm:$0xff] %v1456_v33  ;;  %v1459_v36 = vld [vmem:[%s1866_s22 + $0xf0] sm:$0xff] }
  0x35   : > { %313 = vst [vmem:[%s1871_s12 + $0x20] sm:$0xff] %v1457_v34  ;;  %315 = vst [vmem:[%s1871_s12 + $0x28] sm:$0xff] %v1458_v35  ;;  %v1460_v37 = vld [vmem:[%s1866_s22 + $0xf8] sm:$0xff]  ;;  %v1461_v38 = vld [vmem:[%s1866_s22 + $0x100] sm:$0xff] }
  0x36   : > { %317 = vst [vmem:[%s1871_s12 + $0x30] sm:$0xff] %v1459_v36  ;;  %319 = vst [vmem:[%s1871_s12 + $0x38] sm:$0xff] %v1460_v37  ;;  %v1462_v39 = vld [vmem:[%s1866_s22 + $0x108] sm:$0xff]  ;;  %v1463_v40 = vld [vmem:[%s1866_s22 + $0x110] sm:$0xff] }
  0x37   : > { %321 = vst [vmem:[%s1871_s12 + $0x40] sm:$0xff] %v1461_v38  ;;  %v1464_v41 = vld [vmem:[%s1866_s22 + $0x118] sm:$0xff]  ;;  %323 = vst [vmem:[%s1871_s12 + $0x48] sm:$0xff] %v1462_v39  ;;  %v1465_v42 = vld [vmem:[%s1866_s22 + $0x120] sm:$0xff] }
  0x38   : > { %325 = vst [vmem:[%s1871_s12 + $0x50] sm:$0xff] %v1463_v40  ;;  %327 = vst [vmem:[%s1871_s12 + $0x58] sm:$0xff] %v1464_v41  ;;  %v1466_v43 = vld [vmem:[%s1866_s22 + $0x128] sm:$0xff]  ;;  %v1467_v44 = vld [vmem:[%s1866_s22 + $0x130] sm:$0xff] }
  0x39   : > { %329 = vst [vmem:[%s1871_s12 + $0x60] sm:$0xff] %v1465_v42  ;;  %331 = vst [vmem:[%s1871_s12 + $0x68] sm:$0xff] %v1466_v43  ;;  %v1468_v45 = vld [vmem:[%s1866_s22 + $0x138] sm:$0xff]  ;;  %v1469_v46 = vld [vmem:[%s1866_s22 + $0x140] sm:$0xff] }
  0x3a   : > { %333 = vst [vmem:[%s1871_s12 + $0x70] sm:$0xff] %v1467_v44  ;;  %v1470_v47 = vld [vmem:[%s1866_s22 + $0x148] sm:$0xff]  ;;  %335 = vst [vmem:[%s1871_s12 + $0x78] sm:$0xff] %v1468_v45  ;;  %v1471_v48 = vld [vmem:[%s1866_s22 + $0x150] sm:$0xff] }
  0x3b   : > { %337 = vst [vmem:[%s1871_s12 + $0x80] sm:$0xff] %v1469_v46  ;;  %339 = vst [vmem:[%s1871_s12 + $0x88] sm:$0xff] %v1470_v47  ;;  %v1472_v49 = vld [vmem:[%s1866_s22 + $0x158] sm:$0xff]  ;;  %v1473_v50 = vld [vmem:[%s1866_s22 + $0x160] sm:$0xff] }
  0x3c   : > { %341 = vst [vmem:[%s1871_s12 + $0x90] sm:$0xff] %v1471_v48  ;;  %343 = vst [vmem:[%s1871_s12 + $0x98] sm:$0xff] %v1472_v49  ;;  %v1474_v51 = vld [vmem:[%s1866_s22 + $0x168] sm:$0xff]  ;;  %v1475_v52 = vld [vmem:[%s1866_s22 + $0x170] sm:$0xff] }
  0x3d   : > { %345 = vst [vmem:[%s1871_s12 + $0xa0] sm:$0xff] %v1473_v50  ;;  %v1476_v53 = vld [vmem:[%s1866_s22 + $0x178] sm:$0xff]  ;;  %347 = vst [vmem:[%s1871_s12 + $0xa8] sm:$0xff] %v1474_v51  ;;  %v1477_v54 = vld [vmem:[%s1866_s22 + $0x180] sm:$0xff] }
  0x3e   : > { %349 = vst [vmem:[%s1871_s12 + $0xb0] sm:$0xff] %v1475_v52  ;;  %351 = vst [vmem:[%s1871_s12 + $0xb8] sm:$0xff] %v1476_v53  ;;  %v1478_v55 = vld [vmem:[%s1866_s22 + $0x188] sm:$0xff]  ;;  %v1479_v56 = vld [vmem:[%s1866_s22 + $0x190] sm:$0xff] }
  0x3f   : > { %353 = vst [vmem:[%s1871_s12 + $0xc0] sm:$0xff] %v1477_v54  ;;  %355 = vst [vmem:[%s1871_s12 + $0xc8] sm:$0xff] %v1478_v55  ;;  %v1480_v57 = vld [vmem:[%s1866_s22 + $0x198] sm:$0xff]  ;;  %v1481_v58 = vld [vmem:[%s1866_s22 + $0x1a0] sm:$0xff] }
  0x40   : > { %357 = vst [vmem:[%s1871_s12 + $0xd0] sm:$0xff] %v1479_v56  ;;  %v1482_v59 = vld [vmem:[%s1866_s22 + $0x1a8] sm:$0xff]  ;;  %359 = vst [vmem:[%s1871_s12 + $0xd8] sm:$0xff] %v1480_v57 }
  0x41   : > { %361 = vst [vmem:[%s1871_s12 + $0xe0] sm:$0xff] %v1481_v58  ;;  %363 = vst [vmem:[%s1871_s12 + $0xe8] sm:$0xff] %v1482_v59 }
  0x42   : > { %371 = vsyncadd %s271_s13, 3840 }
  0x43 PF: > { %s372_s23 = scalar_lea.sflag [#allocation3], %s1812_s20 }
  0x44   : > { %1733 = dma.done.wait %s372_s23, 3840 }
  0x45   : > { %1734 = vsyncadd %s372_s23, 4294963456  ;;  %v1705_v60 = vld [vmem:[%s2469_s2] sm:$0xff]   ;;  %v1706_v61 = vld [vmem:[%s2469_s2 + $0x8] sm:$0xff]   ;;  %s377_s29 = smul.u32 240, %s1812_s20 }
  0x46   : > { %1617 = vmatprep.subr.bf16.mxu0 %v1705_v60  ;;  %1649 = vmatprep.subr.bf16.mxu1 %v1705_v60  ;;  %v1707_v62 = vld [vmem:[%s2469_s2 + $0x10] sm:$0xff]   ;;  %v1708_v63 = vld [vmem:[%s2469_s2 + $0x18] sm:$0xff]   ;;  %v1953_v2 = vld [vmem:[%s2468_s1] ss:$0 sm:$0xff] }
  0x47   : > { %1618 = vmatpush3.bf16.msra.mxu0 %v1705_v60  ;;  %1657 = vmatpush3.bf16.msra.mxu1 %v1705_v60  ;;  %s1946_s7 = scalar_lea.vmem [#allocation2], %s377_s29  ;;  %v1962_v7 = vld [vmem:[%s2468_s1 + $0x1] ss:$0 sm:$0xff]  ;;  %v1976_v13 = vld [vmem:[%s2468_s1 + $0x2] ss:$0 sm:$0xff]  ;;  %v1710_v32 = vld [vmem:[%s2469_s2 + $0x28] sm:$0xff]  }
  0x48   : > { %1619 = vmatprep.subr.bf16.mxu0 %v1706_v61  ;;  %1650 = vmatprep.subr.bf16.mxu1 %v1706_v61  ;;  %v1967_v8 = vld [vmem:[%s2469_s2 + $0x20] sm:$0xff]   ;;  %v2064_v51 = vld [vmem:[%s2468_s1 + $0x8] ss:$0 sm:$0xff] }
  0x49   : > { %v517_v11 = vld [vmem:[%s1946_s7 + $0x2] sm:$0xff]  ;;  %v518_v12 = vld [vmem:[%s1946_s7 + $0xa] sm:$0xff]  ;;  %v1504_v22 = vld [vmem:[%s1946_s7 + $0x19] sm:$0xff] }
  0x4a   : > { %v379_v0 = vld [vmem:[%s1946_s7] sm:$0xff]  ;;  %v380_v1 = vld [vmem:[%s1946_s7 + $0x8] sm:$0xff]  ;;  %v554_v14 = vmul.f32 %v1976_v13, %v517_v11  ;;  %v555_v15 = vmul.f32 %v1976_v13, %v518_v12  ;;  %v1487_v16 = vld [vmem:[%s1946_s7 + $0x18] sm:$0xff]  ;;  %v2082_v58 = vmul.f32 %v1504_v22, %v1962_v7 }
  0x4b   : > { %1620 = vmatpush3.bf16.msra.mxu0 %v1706_v61  ;;  %1658 = vmatpush3.bf16.msra.mxu1 %v1706_v61  ;;  %v400_v3 = vmul.f32 %v1953_v2, %v379_v0  ;;  %v401_v4 = vmul.f32 %v1953_v2, %v380_v1  ;;  %v432_v5 = vld [vmem:[%s1946_s7 + $0x1] sm:$0xff]  ;;  %v433_v6 = vld [vmem:[%s1946_s7 + $0x9] sm:$0xff]  ;;  %v2013_v31 = vmul.f32 %v1487_v16, %v1953_v2  ;;  %v2026_v38 = vld [vmem:[%s1946_s7 + $0x38] sm:$0xff] }
  0x4c   : > { %1621 = vmatprep.subr.bf16.mxu0 %v1707_v62  ;;  %1651 = vmatprep.subr.bf16.mxu1 %v1707_v62  ;;  %v469_v9 = vmul.f32 %v1962_v7, %v432_v5  ;;  %v470_v10 = vmul.f32 %v1962_v7, %v433_v6  ;;  %v1488_v17 = vld [vmem:[%s1946_s7 + $0x20] sm:$0xff]  ;;  %v2023_v37 = vld [vmem:[%s1946_s7 + $0x30] sm:$0xff]  ;;  %v2076_v56 = vld [vmem:[%s1946_s7 + $0x68] sm:$0xff] }
  0x4d   : > { %v1985_v18 = vld [vmem:[%s2468_s1 + $0x3] ss:$0 sm:$0xff]  ;;  %v1995_v24 = vld [vmem:[%s2468_s1 + $0x4] ss:$0 sm:$0xff]  ;;  %v2002_v28 = vld [vmem:[%s1946_s7 + $0x1a] sm:$0xff]  ;;  %v2049_v45 = vmul.f32 %v1488_v17, %v1953_v2 }
  0x4e   : > { %v485_v19 = vadd.f32 %v469_v9, %v400_v3  ;;  %v486_v20 = vadd.f32 %v470_v10, %v401_v4  ;;  %v641_v21 = vmul.f32 %v1985_v18, %v1487_v16  ;;  %v1990_v23 = vld [vmem:[%s1946_s7 + $0x21] sm:$0xff]  ;;  %v642_v25 = vmul.f32 %v1985_v18, %v1488_v17  ;;  %v2038_v42 = vld [vmem:[%s1946_s7 + $0x31] sm:$0xff]  ;;  %v2041_v43 = vld [vmem:[%s1946_s7 + $0x39] sm:$0xff] }
  0x4f   : > { %1622 = vmatpush3.bf16.msra.mxu0 %v1707_v62  ;;  %1659 = vmatpush3.bf16.msra.mxu1 %v1707_v62  ;;  %v726_v26 = vmul.f32 %v1995_v24, %v1504_v22  ;;  %v727_v27 = vmul.f32 %v1995_v24, %v1990_v23  ;;  %v2005_v29 = vld [vmem:[%s1946_s7 + $0x22] sm:$0xff]  ;;  %v2056_v49 = vld [vmem:[%s1946_s7 + $0x32] sm:$0xff]  ;;  %v2059_v50 = vld [vmem:[%s1946_s7 + $0x3a] sm:$0xff]  ;;  %v409_v62 = vmul.f32 %v1953_v2, %v2076_v56 }
  0x50   : > { %1623 = vmatprep.subr.bf16.mxu0 %v1708_v63  ;;  %1652 = vmatprep.subr.bf16.mxu1 %v1708_v63  ;;  %v2010_v30 = vld [vmem:[%s2468_s1 + $0x5] ss:$0 sm:$0xff]  ;;  %v570_v33 = vadd.f32 %v554_v14, %v485_v19  ;;  %v571_v34 = vadd.f32 %v555_v15, %v486_v20  ;;  %v2031_v39 = vld [vmem:[%s2468_s1 + $0x6] ss:$0 sm:$0xff]  ;;  %v2046_v44 = vld [vmem:[%s2468_s1 + $0x7] ss:$0 sm:$0xff]  ;;  %v1068_v53 = vmul.f32 %v2064_v51, %v2056_v49 }
  0x51   : > { %v811_v35 = vmul.f32 %v2010_v30, %v2002_v28  ;;  %v812_v36 = vmul.f32 %v2010_v30, %v2005_v29  ;;  %v898_v40 = vmul.f32 %v2031_v39, %v2023_v37  ;;  %v899_v41 = vmul.f32 %v2031_v39, %v2026_v38  ;;  %v2073_v55 = vld [vmem:[%s1946_s7 + $0x60] sm:$0xff]  ;;  %v2095_v1 = vld [vmem:[%s1946_s7 + $0x6a] sm:$0xff]  ;;  %v2111_v11 = vld [vmem:[%s1946_s7 + $0x78] sm:$0xff] }
  0x52   : > { %v657_v46 = vadd.f32 %v641_v21, %v570_v33  ;;  %v658_v47 = vadd.f32 %v642_v25, %v571_v34  ;;  %v983_v48 = vmul.f32 %v2046_v44, %v2038_v42  ;;  %v984_v52 = vmul.f32 %v2046_v44, %v2041_v43  ;;  %v2079_v57 = vld [vmem:[%s1946_s7 + $0x61] sm:$0xff]  ;;  %v2121_v19 = vld [vmem:[%s1946_s7 + $0x79] sm:$0xff] }
  0x53   : > { %1624 = vmatpush3.bf16.msra.mxu0 %v1708_v63  ;;  %1660 = vmatpush3.bf16.msra.mxu1 %v1708_v63  ;;  %v1069_v54 = vmul.f32 %v2064_v51, %v2059_v50  ;;  %v408_v61 = vmul.f32 %v1953_v2, %v2073_v55  ;;  %v2089_v63 = vld [vmem:[%s1946_s7 + $0x69] sm:$0xff]  ;;  %v477_v3 = vmul.f32 %v1962_v7, %v2079_v57  ;;  %v2114_v12 = vld [vmem:[%s1946_s7 + $0x80] sm:$0xff] }
  0x54   : > { %1625 = vmatprep.subr.bf16.mxu0 %v1967_v8  ;;  %1653 = vmatprep.subr.bf16.mxu1 %v1967_v8  ;;  %v742_v59 = vadd.f32 %v726_v26, %v657_v46  ;;  %v743_v60 = vadd.f32 %v727_v27, %v658_v47  ;;  %v2092_v0 = vld [vmem:[%s1946_s7 + $0x62] sm:$0xff]  ;;  %v478_v4 = vmul.f32 %v1962_v7, %v2089_v63  ;;  %v2131_v27 = vld [vmem:[%s1946_s7 + $0x7a] sm:$0xff]  ;;  %v2144_v47 = vld [vmem:[%s1946_s7 + $0x90] sm:$0xff] }
  0x55   : > { %v562_v5 = vmul.f32 %v1976_v13, %v2092_v0  ;;  %v1711_v6 = vld [vmem:[%s2469_s2 + $0x30] sm:$0xff]   ;;  %v563_v10 = vmul.f32 %v1976_v13, %v2095_v1  ;;  %v493_v14 = vadd.f32 %v477_v3, %v408_v61  ;;  %v649_v16 = vmul.f32 %v1985_v18, %v2111_v11  ;;  %2475 = vst [vmem:[#allocation9_spill] sm:$0xff] %v2131_v27 }
  0x56   : > { %v827_v9 = vadd.f32 %v811_v35, %v742_v59  ;;  %v494_v15 = vadd.f32 %v478_v4, %v409_v62  ;;  %v650_v17 = vmul.f32 %v1985_v18, %v2114_v12  ;;  %v2124_v20 = vld [vmem:[%s1946_s7 + $0x81] sm:$0xff]  ;;  %v734_v25 = vmul.f32 %v1995_v24, %v2121_v19  ;;  %v2147_v59 = vld [vmem:[%s1946_s7 + $0x98] sm:$0xff] }
  0x57   : > { %1626 = vmatpush3.bf16.msra.mxu0 %v1967_v8  ;;  %1661 = vmatpush3.bf16.msra.mxu1 %v1967_v8  ;;  %v828_v8 = vadd.f32 %v812_v36, %v743_v60  ;;  %2474 = vst [vmem:[#allocation8_spill] sm:$0xff] %v2124_v20  ;;  %v735_v26 = vmul.f32 %v1995_v24, %v2124_v20  ;;  %v2134_v35 = vld [vmem:[%s1946_s7 + $0x82] sm:$0xff]  ;;  %v2154_v4 = vld [vmem:[%s1946_s7 + $0x91] sm:$0xff] }
  0x58   : > { %1627 = vmatprep.subr.bf16.mxu0 %v1710_v32  ;;  %1654 = vmatprep.subr.bf16.mxu1 %v1710_v32  ;;  %v914_v21 = vadd.f32 %v898_v40, %v827_v9  ;;  %v578_v33 = vadd.f32 %v562_v5, %v493_v14  ;;  %v579_v34 = vadd.f32 %v563_v10, %v494_v15  ;;  %v1712_v40 = vld [vmem:[%s2469_s2 + $0x38] sm:$0xff]  }
  0x59   : > { %v915_v22 = vadd.f32 %v899_v41, %v828_v8  ;;  %2476 = vst [vmem:[#allocation10_spill] sm:$0xff] %v2134_v35  ;;  %v819_v36 = vmul.f32 %v2010_v30, %v2131_v27  ;;  %v906_v62 = vmul.f32 %v2031_v39, %v2144_v47  ;;  %v907_v3 = vmul.f32 %v2031_v39, %v2147_v59  ;;  %v2164_v10 = vld [vmem:[%s1946_s7 + $0x92] sm:$0xff] }
  0x5a   : > { %v999_v41 = vadd.f32 %v983_v48, %v914_v21  ;;  %v665_v60 = vadd.f32 %v649_v16, %v578_v33  ;;  %v666_v61 = vadd.f32 %v650_v17, %v579_v34  ;;  %v2157_v48 = vld [vmem:[%s1946_s7 + $0x99] sm:$0xff]  ;;  %v991_v9 = vmul.f32 %v2046_v44, %v2154_v4 }
  0x5b   : > { %1628 = vmatpush3.bf16.msra.mxu0 %v1710_v32  ;;  %1662 = vmatpush3.bf16.msra.mxu1 %v1710_v32  ;;  %v1000_v46 = vadd.f32 %v984_v52, %v915_v22  ;;  %v820_v32 = vmul.f32 %v2010_v30, %v2134_v35  ;;  %v992_v8 = vmul.f32 %v2046_v44, %v2157_v48  ;;  %v2167_v16 = vld [vmem:[%s1946_s7 + $0x9a] sm:$0xff] }
  0x5c   : > { %1629 = vmatprep.subr.bf16.mxu0 %v1711_v6  ;;  %1655 = vmatprep.subr.bf16.mxu1 %v1711_v6  ;;  %v1084_v52 = vadd.f32 %v1068_v53, %v999_v41  ;;  %v750_v14 = vadd.f32 %v734_v25, %v665_v60  ;;  %v751_v15 = vadd.f32 %v735_v26, %v666_v61 }
  0x5d   : > { %v1085_v5 = vadd.f32 %v1069_v54, %v1000_v46  ;;  %v1076_v17 = vmul.f32 %v2064_v51, %v2164_v10  ;;  %v1077_v54 = vmul.f32 %v2064_v51, %v2167_v16  ;;  %v472_v21 = vmul.f32 %v1990_v23, %v1962_v7 }
  0x5e   : > { %v835_v22 = vadd.f32 %v819_v36, %v750_v14  ;;  %v836_v33 = vadd.f32 %v820_v32, %v751_v15  ;;  %v556_v25 = vmul.f32 %v2002_v28, %v1976_v13  ;;  %v557_v34 = vmul.f32 %v2005_v29, %v1976_v13  ;;  %v2205_v14 = vld [vmem:[%s1946_s7 + $0x49] sm:$0xff] }
  0x5f   : > { %1630 = vmatpush3.bf16.msra.mxu0 %v1711_v6  ;;  %1663 = vmatpush3.bf16.msra.mxu1 %v1711_v6  ;;  %v1132_v53 = vpack.c.bf16 %v1085_v5, %v1084_v52  ;;  %v487_v6 = vadd.f32 %v2082_v58, %v2013_v31  ;;  %v488_v26 = vadd.f32 %v472_v21, %v2049_v45  ;;  %v2208_v21 = vld [vmem:[%s1946_s7 + $0x51] sm:$0xff] }
  0x60   : > { %1631 = vmatprep.subr.bf16.mxu0 %v1712_v40  ;;  %1656 = vmatprep.subr.bf16.mxu1 %v1712_v40  ;;  %v643_v41 = vmul.f32 %v2023_v37, %v1985_v18  ;;  %v644_v23 = vmul.f32 %v2026_v38, %v1985_v18  ;;  %v922_v31 = vadd.f32 %v906_v62, %v835_v22  ;;  %v2196_v62 = vld [vmem:[%s1946_s7 + $0x50] sm:$0xff] }
  0x61   : > { %1633 = vmatprep.mubr.bf16.mxu0 %v1132_v53  ;;  %v923_v58 = vadd.f32 %v907_v3, %v836_v33  ;;  %v572_v28 = vadd.f32 %v556_v25, %v487_v6  ;;  %v573_v36 = vadd.f32 %v557_v34, %v488_v26  ;;  %v728_v45 = vmul.f32 %v2038_v42, %v1995_v24  ;;  %v2213_v33 = vld [vmem:[%s1946_s7 + $0x4a] sm:$0xff] }
  0x62   : > { %v729_v29 = vmul.f32 %v2041_v43, %v1995_v24  ;;  %v1007_v46 = vadd.f32 %v991_v9, %v922_v31  ;;  %v813_v61 = vmul.f32 %v2056_v49, %v2010_v30  ;;  %v814_v52 = vmul.f32 %v2059_v50, %v2010_v30 }
  0x63   : > { %1632 = vmatpush3.bf16.msra.mxu0 %v1712_v40  ;;  %1664 = vmatpush3.bf16.msra.mxu1 %v1712_v40  ;;  %v1008_v32 = vadd.f32 %v992_v8, %v923_v58  ;;  %v659_v60 = vadd.f32 %v643_v41, %v572_v28  ;;  %v2193_v40 = vld [vmem:[%s1946_s7 + $0x48] sm:$0xff]  ;;  %v660_v3 = vadd.f32 %v644_v23, %v573_v36  ;;  %v2226_v58 = vld [vmem:[%s1946_s7 + $0x52] sm:$0xff] }
  0x64   : > { %v900_v5 = vmul.f32 %v2031_v39, %v2193_v40  ;;  %v901_v9 = vmul.f32 %v2031_v39, %v2196_v62  ;;  %v1092_v8 = vadd.f32 %v1076_v17, %v1007_v46  ;;  %v985_v22 = vmul.f32 %v2046_v44, %v2205_v14 }
  0x65   : > { %v1093_v15 = vadd.f32 %v1077_v54, %v1008_v32  ;;  %v744_v53 = vadd.f32 %v728_v45, %v659_v60  ;;  %v745_v6 = vadd.f32 %v729_v29, %v660_v3  ;;  %v986_v25 = vmul.f32 %v2046_v44, %v2208_v21 }
  0x66   : > { %v1070_v26 = vmul.f32 %v2064_v51, %v2213_v33  ;;  %v410_v34 = vmul.f32 %v2111_v11, %v1953_v2  ;;  %v411_v41 = vmul.f32 %v2114_v12, %v1953_v2  ;;  %v479_v23 = vmul.f32 %v2121_v19, %v1962_v7 }
  0x67   : > { %v1136_v17 = vpack.c.bf16 %v1093_v15, %v1092_v8  ;;  %v829_v54 = vadd.f32 %v813_v61, %v744_v53  ;;  %v830_v31 = vadd.f32 %v814_v52, %v745_v6  ;;  %v480_v28 = vmul.f32 %v2124_v20, %v1962_v7 }
  0x68   : > { %v564_v36 = vmul.f32 %v2131_v27, %v1976_v13  ;;  %v565_v45 = vmul.f32 %v2134_v35, %v1976_v13  ;;  %v1071_v46 = vmul.f32 %v2064_v51, %v2226_v58  ;;  %v495_v32 = vadd.f32 %v479_v23, %v410_v34  ;;  %v2247_v34 = vld [vmem:[%s1946_s7 + $0xa8] sm:$0xff] }
  0x69   : > { %1641 = vmatprep.mubr.bf16.mxu1 %v1136_v17  ;;  %v916_v29 = vadd.f32 %v900_v5, %v829_v54  ;;  %v651_v60 = vmul.f32 %v2144_v47, %v1985_v18  ;;  %v917_v61 = vadd.f32 %v901_v9, %v830_v31  ;;  %v496_v3 = vadd.f32 %v480_v28, %v411_v41  ;;  %v2252_v41 = vld [vmem:[%s1946_s7 + $0xb0] sm:$0xff] }
  0x6a   : > { %v652_v52 = vmul.f32 %v2147_v59, %v1985_v18  ;;  %v736_v8 = vmul.f32 %v2154_v4, %v1995_v24  ;;  %v580_v5 = vadd.f32 %v564_v36, %v495_v32  ;;  %v737_v53 = vmul.f32 %v2157_v48, %v1995_v24  ;;  %v2257_v23 = vld [vmem:[%s1946_s7 + $0xa9] sm:$0xff] }
  0x6b   : > { %v1001_v15 = vadd.f32 %v985_v22, %v916_v29  ;;  %v821_v6 = vmul.f32 %v2164_v10, %v2010_v30  ;;  %v1002_v9 = vadd.f32 %v986_v25, %v917_v61  ;;  %v581_v17 = vadd.f32 %v565_v45, %v496_v3  ;;  %v2262_v29 = vld [vmem:[%s1946_s7 + $0xb1] sm:$0xff] }
  0x6c   : > { %v822_v54 = vmul.f32 %v2167_v16, %v2010_v30  ;;  %v908_v22 = vmul.f32 %v2031_v39, %v2247_v34  ;;  %v667_v28 = vadd.f32 %v651_v60, %v580_v5  ;;  %v909_v36 = vmul.f32 %v2031_v39, %v2252_v41  ;;  %v2267_v45 = vld [vmem:[%s1946_s7 + $0xaa] sm:$0xff] }
  0x6d   : > { %v1086_v31 = vadd.f32 %v1070_v26, %v1001_v15  ;;  %v993_v25 = vmul.f32 %v2046_v44, %v2257_v23  ;;  %v1087_v32 = vadd.f32 %v1071_v46, %v1002_v9  ;;  %v668_v61 = vadd.f32 %v652_v52, %v581_v17  ;;  %v2284_v17 = vld [vmem:[%s1946_s7 + $0xb2] sm:$0xff] }
  0x6e   : > { %v994_v3 = vmul.f32 %v2046_v44, %v2262_v29  ;;  %v1078_v26 = vmul.f32 %v2064_v51, %v2267_v45  ;;  %v752_v60 = vadd.f32 %v736_v8, %v667_v28  ;;  %v404_v15 = vmul.f32 %v2023_v37, %v1953_v2 }
  0x6f   : > { %v405_v5 = vmul.f32 %v2026_v38, %v1953_v2  ;;  %v473_v35 = vmul.f32 %v2038_v42, %v1962_v7  ;;  %v1133_v27 = vpack.c.bf16 %v1087_v32, %v1086_v31  ;;  %v753_v20 = vadd.f32 %v737_v53, %v668_v61 }
  0x70   : > { %v474_v46 = vmul.f32 %v2041_v43, %v1962_v7  ;;  %v558_v52 = vmul.f32 %v2056_v49, %v1976_v13  ;;  %v837_v9 = vadd.f32 %v821_v6, %v752_v60  ;;  %v559_v37 = vmul.f32 %v2059_v50, %v1976_v13 }
  0x71   : > { %v489_v8 = vadd.f32 %v473_v35, %v404_v15  ;;  %v645_v38 = vmul.f32 %v2193_v40, %v1985_v18  ;;  %1634 = vmatmul.mubr.bf16.vlgmr.msra.gmra.mrb[0].mxu0 %v1133_v27  ;;  %v838_v42 = vadd.f32 %v822_v54, %v753_v20  ;;  %v1079_v53 = vmul.f32 %v2064_v51, %v2284_v17 }
  0x72   : > { %v490_v31 = vadd.f32 %v474_v46, %v405_v5  ;;  %v646_v43 = vmul.f32 %v2196_v62, %v1985_v18  ;;  %v924_v49 = vadd.f32 %v908_v22, %v837_v9  ;;  %v730_v35 = vmul.f32 %v2205_v14, %v1995_v24 }
  0x73   : > { %v574_v6 = vadd.f32 %v558_v52, %v489_v8  ;;  %v731_v50 = vmul.f32 %v2208_v21, %v1995_v24  ;;  %v925_v28 = vadd.f32 %v909_v36, %v838_v42  ;;  %v815_v20 = vmul.f32 %v2213_v33, %v2010_v30 }
  0x74   : > { %v575_v32 = vadd.f32 %v559_v37, %v490_v31  ;;  %v816_v27 = vmul.f32 %v2226_v58, %v2010_v30  ;;  %v1009_v54 = vadd.f32 %v993_v25, %v924_v49  ;;  %v902_v22 = vmul.f32 %v2031_v39, %v2073_v55 }
  0x75   : > { %v661_v61 = vadd.f32 %v645_v38, %v574_v6  ;;  %v903_v60 = vmul.f32 %v2031_v39, %v2076_v56  ;;  %v1010_v15 = vadd.f32 %v994_v3, %v925_v28  ;;  %v987_v36 = vmul.f32 %v2046_v44, %v2079_v57 }
  0x76   : > { %v662_v5 = vadd.f32 %v646_v43, %v575_v32  ;;  %v988_v46 = vmul.f32 %v2046_v44, %v2089_v63  ;;  %v1094_v52 = vadd.f32 %v1078_v26, %v1009_v54  ;;  %v1072_v25 = vmul.f32 %v2064_v51, %v2092_v0 }
  0x77   : > { %v746_v9 = vadd.f32 %v730_v35, %v661_v61  ;;  %v412_v8 = vmul.f32 %v2144_v47, %v1953_v2  ;;  %v1095_v37 = vadd.f32 %v1079_v53, %v1010_v15  ;;  %v413_v3 = vmul.f32 %v2147_v59, %v1953_v2  ;;  %v2342_v15 = vld [vmem:[%s1946_s7 + $0xc8] sm:$0xff] }
  0x78   : > { %v747_v38 = vadd.f32 %v731_v50, %v662_v5  ;;  %v481_v42 = vmul.f32 %v2154_v4, %v1962_v7  ;;  %v482_v43 = vmul.f32 %v2157_v48, %v1962_v7  ;;  %v566_v26 = vmul.f32 %v2164_v10, %v1976_v13 }
  0x79   : > { %v831_v31 = vadd.f32 %v815_v20, %v746_v9  ;;  %v567_v49 = vmul.f32 %v2167_v16, %v1976_v13  ;;  %v1137_v6 = vpack.c.bf16 %v1095_v37, %v1094_v52  ;;  %v653_v59 = vmul.f32 %v2247_v34, %v1985_v18  ;;  %v2349_v9 = vld [vmem:[%s1946_s7 + $0xc1] sm:$0xff] }
  0x7a   : > { %v832_v47 = vadd.f32 %v816_v27, %v747_v38  ;;  %v497_v53 = vadd.f32 %v481_v42, %v412_v8  ;;  %v1073_v4 = vmul.f32 %v2064_v51, %v2095_v1  ;;  %v498_v50 = vadd.f32 %v482_v43, %v413_v3  ;;  %v2352_v8 = vld [vmem:[%s1946_s7 + $0xc9] sm:$0xff] }
  0x7b   : > { %v918_v35 = vadd.f32 %v902_v22, %v831_v31  ;;  %v654_v48 = vmul.f32 %v2252_v41, %v1985_v18  ;;  %1642 = vmatmul.mubr.bf16.vlgmr.msra.gmra.mrb[0].mxu1 %v1137_v6  ;;  %v738_v28 = vmul.f32 %v2257_v23, %v1995_v24  ;;  %v739_v32 = vmul.f32 %v2262_v29, %v1995_v24  ;;  %v2339_v22 = vld [vmem:[%s1946_s7 + $0xc0] sm:$0xff] }
  0x7c   : > { %v919_v10 = vadd.f32 %v903_v60, %v832_v47  ;;  %v582_v16 = vadd.f32 %v566_v26, %v497_v53  ;;  %v583_v27 = vadd.f32 %v567_v49, %v498_v50  ;;  %v823_v54 = vmul.f32 %v2267_v45, %v2010_v30  ;;  %v2359_v42 = vld [vmem:[%s1946_s7 + $0xc2] sm:$0xff] }
  0x7d   : > { %v1003_v20 = vadd.f32 %v987_v36, %v918_v35  ;;  %v824_v61 = vmul.f32 %v2284_v17, %v2010_v30  ;;  %v910_v52 = vmul.f32 %v2031_v39, %v2339_v22  ;;  %v911_v36 = vmul.f32 %v2031_v39, %v2342_v15 }
  0x7e   : > { %v1004_v60 = vadd.f32 %v988_v46, %v919_v10  ;;  %v669_v5 = vadd.f32 %v653_v59, %v582_v16  ;;  %v670_v38 = vadd.f32 %v654_v48, %v583_v27  ;;  %v995_v3 = vmul.f32 %v2046_v44, %v2349_v9 }
  0x7f   : > { %v1088_v37 = vadd.f32 %v1072_v25, %v1003_v20  ;;  %v996_v46 = vmul.f32 %v2046_v44, %v2352_v8  ;;  %v1080_v26 = vmul.f32 %v2064_v51, %v2359_v42  ;;  %v406_v49 = vmul.f32 %v2193_v40, %v1953_v2  ;;  %v1585_v40 = vld [vmem:[%s1946_s7 + $0xca] sm:$0xff] }
  0x80   : > { %v1089_v31 = vadd.f32 %v1073_v4, %v1004_v60  ;;  %v754_v43 = vadd.f32 %v738_v28, %v669_v5  ;;  %v755_v6 = vadd.f32 %v739_v32, %v670_v38  ;;  %v407_v25 = vmul.f32 %v2196_v62, %v1953_v2 }
  0x81   : > { %v475_v47 = vmul.f32 %v2205_v14, %v1962_v7  ;;  %v476_v53 = vmul.f32 %v2208_v21, %v1962_v7  ;;  %v560_v4 = vmul.f32 %v2213_v33, %v1976_v13  ;;  %v561_v50 = vmul.f32 %v2226_v58, %v1976_v13 }
  0x82   : > { %v1134_v59 = vpack.c.bf16 %v1089_v31, %v1088_v37  ;;  %v839_v35 = vadd.f32 %v823_v54, %v754_v43  ;;  %v840_v48 = vadd.f32 %v824_v61, %v755_v6  ;;  %v647_v62 = vmul.f32 %v1985_v18, %v2073_v55  ;;  %v2477_v37 = vld [vmem:[#allocation8_spill] sm:$0xff] }
  0x83   : > { %v491_v10 = vadd.f32 %v475_v47, %v406_v49  ;;  %v492_v16 = vadd.f32 %v476_v53, %v407_v25  ;;  %v1081_v28 = vmul.f32 %v2064_v51, %v1585_v40  ;;  %v648_v21 = vmul.f32 %v1985_v18, %v2076_v56  ;;  %v2479_v47 = vld [vmem:[#allocation10_spill] sm:$0xff] }
  0x84   : > { %1637 = vmatprep.mubr.bf16.mxu0 %v1134_v59  ;;  %v926_v14 = vadd.f32 %v910_v52, %v839_v35  ;;  %v732_v33 = vmul.f32 %v1995_v24, %v2079_v57  ;;  %v927_v32 = vadd.f32 %v911_v36, %v840_v48  ;;  %v733_v27 = vmul.f32 %v1995_v24, %v2089_v63  ;;  %v1552_v35 = vld [vmem:[%s1946_s7 + $0xd8] sm:$0xff] }
  0x85   : > { %v576_v20 = vadd.f32 %v560_v4, %v491_v10  ;;  %v577_v58 = vadd.f32 %v561_v50, %v492_v16  ;;  %v817_v55 = vmul.f32 %v2010_v30, %v2092_v0  ;;  %v818_v61 = vmul.f32 %v2010_v30, %v2095_v1  ;;  %v1553_v4 = vld [vmem:[%s1946_s7 + $0xe0] sm:$0xff] }
  0x86   : > { %v1011_v54 = vadd.f32 %v995_v3, %v926_v14  ;;  %v1012_v60 = vadd.f32 %v996_v46, %v927_v32  ;;  %v904_v56 = vmul.f32 %v2031_v39, %v2111_v11  ;;  %v905_v36 = vmul.f32 %v2031_v39, %v2114_v12 }
  0x87   : > { %v663_v5 = vadd.f32 %v647_v62, %v576_v20  ;;  %v664_v52 = vadd.f32 %v648_v21, %v577_v58  ;;  %v989_v63 = vmul.f32 %v2046_v44, %v2121_v19  ;;  %v990_v38 = vmul.f32 %v2046_v44, %v2477_v37  ;;  %v1586_v20 = vld [vmem:[%s1946_s7 + $0xda] sm:$0xff]  ;;  %v1587_v58 = vld [vmem:[%s1946_s7 + $0xe2] sm:$0xff] }
  0x88   : > { %v1096_v57 = vadd.f32 %v1080_v26, %v1011_v54  ;;  %v1097_v0 = vadd.f32 %v1081_v28, %v1012_v60  ;;  %v414_v1 = vmul.f32 %v2247_v34, %v1953_v2  ;;  %v415_v46 = vmul.f32 %v2252_v41, %v1953_v2  ;;  %v1569_v28 = vld [vmem:[%s1946_s7 + $0xd9] sm:$0xff] }
  0x89   : > { %v748_v3 = vadd.f32 %v732_v33, %v663_v5  ;;  %v749_v31 = vadd.f32 %v733_v27, %v664_v52  ;;  %v483_v11 = vmul.f32 %v2257_v23, %v1962_v7  ;;  %v484_v12 = vmul.f32 %v2262_v29, %v1962_v7  ;;  %v2478_v29 = vld [vmem:[#allocation9_spill] sm:$0xff] }
  0x8a   : > { %v568_v19 = vmul.f32 %v2267_v45, %v1976_v13  ;;  %v1138_v43 = vpack.c.bf16 %v1097_v0, %v1096_v57  ;;  %v569_v6 = vmul.f32 %v2284_v17, %v1976_v13  ;;  %v655_v2 = vmul.f32 %v2339_v22, %v1985_v18 }
  0x8b   : > { %v833_v26 = vadd.f32 %v817_v55, %v748_v3  ;;  %v834_v49 = vadd.f32 %v818_v61, %v749_v31  ;;  %v499_v34 = vadd.f32 %v483_v11, %v414_v1  ;;  %v500_v25 = vadd.f32 %v484_v12, %v415_v46 }
  0x8c   : > { %v656_v41 = vmul.f32 %v2342_v15, %v1985_v18  ;;  %1645 = vmatprep.mubr.bf16.mxu1 %v1138_v43  ;;  %v1074_v45 = vmul.f32 %v2064_v51, %v2478_v29  ;;  %v1075_v13 = vmul.f32 %v2064_v51, %v2479_v47  ;;  %v740_v59 = vmul.f32 %v2349_v9, %v1995_v24  ;;  %v1570_v9 = vld [vmem:[%s1946_s7 + $0xe1] sm:$0xff] }
  0x8d   : > { %v920_v7 = vadd.f32 %v904_v56, %v833_v26  ;;  %v921_v23 = vadd.f32 %v905_v36, %v834_v49  ;;  %v584_v17 = vadd.f32 %v568_v19, %v499_v34  ;;  %v585_v53 = vadd.f32 %v569_v6, %v500_v25 }
  0x8e   : > { %v741_v22 = vmul.f32 %v2352_v8, %v1995_v24  ;;  %v825_v10 = vmul.f32 %v2359_v42, %v2010_v30  ;;  %v826_v16 = vmul.f32 %v1585_v40, %v2010_v30  ;;  %v912_v24 = vmul.f32 %v2031_v39, %v1552_v35 }
  0x8f   : > { %v1005_v18 = vadd.f32 %v989_v63, %v920_v7  ;;  %v1006_v15 = vadd.f32 %v990_v38, %v921_v23  ;;  %v671_v50 = vadd.f32 %v655_v2, %v584_v17  ;;  %v672_v48 = vadd.f32 %v656_v41, %v585_v53 }
  0x90   : > { %v913_v8 = vmul.f32 %v2031_v39, %v1553_v4  ;;  %v997_v42 = vmul.f32 %v2046_v44, %v1569_v28  ;;  %v998_v30 = vmul.f32 %v2046_v44, %v1570_v9  ;;  %v1082_v61 = vmul.f32 %v2064_v51, %v1586_v20 }
  0x91   : > { %v1090_v62 = vadd.f32 %v1074_v45, %v1005_v18  ;;  %v1091_v14 = vadd.f32 %v1075_v13, %v1006_v15  ;;  %v756_v21 = vadd.f32 %v740_v59, %v671_v50  ;;  %v757_v33 = vadd.f32 %v741_v22, %v672_v48 }
  0x92   : > { %v1083_v39 = vmul.f32 %v2064_v51, %v1587_v58 }
  0x93   : > { %v1135_v32 = vpack.c.bf16 %v1091_v14, %v1090_v62  ;;  %v841_v27 = vadd.f32 %v825_v10, %v756_v21  ;;  %v842_v54 = vadd.f32 %v826_v16, %v757_v33 }
  0x95   : > { %1638 = vmatmul.mubr.bf16.gmra.mrb[4].mxu0 %v1135_v32  ;;  %v928_v40 = vadd.f32 %v912_v24, %v841_v27  ;;  %v929_v55 = vadd.f32 %v913_v8, %v842_v54 }
  0x97   : > { %v1013_v60 = vadd.f32 %v997_v42, %v928_v40  ;;  %v1014_v5 = vadd.f32 %v998_v30, %v929_v55 }
  0x99   : > { %v1098_v52 = vadd.f32 %v1082_v61, %v1013_v60  ;;  %v1099_v56 = vadd.f32 %v1083_v39, %v1014_v5 }
  0x9b   : > { %v1139_v57 = vpack.c.bf16 %v1099_v56, %v1098_v52 }
  0x9d   : > { %1646 = vmatmul.mubr.bf16.gmra.mrb[4].mxu1 %v1139_v57 }
 0x144   : > { %v1635_v44 = vpop.f32.mrb[0].mxu0 }
 0x145   : > { %1303 = vst [vmem:[%s1818_s28 + $0x10] sm:$0xff] %v1635_v44  ;;  %v1238_v36 = vpop.f32.mrb[1].mxu0 }
 0x146   : > { %1301 = vst [vmem:[%s1818_s28] sm:$0xff] %v1238_v36  ;;  %v1636_v63 = vpop.f32.mrb[2].mxu0 }
 0x147   : > { %1304 = vst [vmem:[%s1818_s28 + $0x18] sm:$0xff] %v1636_v63  ;;  %v1241_v51 = vpop.f32.mrb[3].mxu0 }
 0x148   : > { %1302 = vst [vmem:[%s1818_s28 + $0x8] sm:$0xff] %v1241_v51 }
 0x14e   : > { %v1643_v37 = vpop.f32.mrb[0].mxu1 }
 0x14f   : > { %1311 = vst [vmem:[%s1818_s28 + $0x50] sm:$0xff] %v1643_v37  ;;  %v1270_v38 = vpop.f32.mrb[1].mxu1 }
 0x150   : > { %1309 = vst [vmem:[%s1818_s28 + $0x40] sm:$0xff] %v1270_v38  ;;  %v1644_v0 = vpop.f32.mrb[2].mxu1 }
 0x151   : > { %1312 = vst [vmem:[%s1818_s28 + $0x58] sm:$0xff] %v1644_v0  ;;  %v1273_v3 = vpop.f32.mrb[3].mxu1 }
 0x152   : > { %1310 = vst [vmem:[%s1818_s28 + $0x48] sm:$0xff] %v1273_v3 }
 0x168   : > { %v1639_v31 = vpop.f32.mrb[4].mxu0 }
 0x169   : > { %1307 = vst [vmem:[%s1818_s28 + $0x30] sm:$0xff] %v1639_v31  ;;  %v1254_v1 = vpop.f32.mrb[5].mxu0 }
 0x16a   : > { %1305 = vst [vmem:[%s1818_s28 + $0x20] sm:$0xff] %v1254_v1  ;;  %v1640_v46 = vpop.f32.mrb[6].mxu0 }
 0x16b   : > { %1308 = vst [vmem:[%s1818_s28 + $0x38] sm:$0xff] %v1640_v46  ;;  %v1257_v11 = vpop.f32.mrb[7].mxu0 }
 0x16c   : > { %1306 = vst [vmem:[%s1818_s28 + $0x28] sm:$0xff] %v1257_v11 }
 0x170   : > { %v1647_v12 = vpop.f32.mrb[4].mxu1 }
 0x171   : > { %1315 = vst [vmem:[%s1818_s28 + $0x70] sm:$0xff] %v1647_v12  ;;  %v1286_v19 = vpop.f32.mrb[5].mxu1 }
 0x172   : > { %1313 = vst [vmem:[%s1818_s28 + $0x60] sm:$0xff] %v1286_v19  ;;  %v1648_v43 = vpop.f32.mrb[6].mxu1 }
 0x173   : > { %1316 = vst [vmem:[%s1818_s28 + $0x78] sm:$0xff] %v1648_v43  ;;  %v1289_v26 = vpop.f32.mrb[7].mxu1 }
 0x174   : > { %1314 = vst [vmem:[%s1818_s28 + $0x68] sm:$0xff] %v1289_v26 }
 0x175 PF: > { %s13_s16 = sadd.s32 1, %s1753_s16   ;;  %s2480_s12 = smov %s1745_s14 }
 0x176   : > { %p10_p9 = scmp.ge.s32.totalorder %s13_s16, 6   ;;  %s2481_s13 = smov %s1749_s15 }
 0x177   : > { %s2482_s14 = smov %s2485_s17  ;;  %s2483_s15 = smov %s2489_s18 }
 0x178   :  { %12 = sbr.rel (!%p10_p9) target bundleno = 3 (0x3), region = 156 }
 0x17f   :  { %1349 = vsyncmov [#allocation3] }
 0x182   :  { %s1350_s28 = vpop.sfrf %1349 }
 0x183   :  { %p1599_p10 = scmp.ne.s32.totalorder %s1350_s28, 0 }
 0x185   :  { %1354 = shalt.err (%p1599_p10)  }
 0x186   :  { %1356 = vsyncmov [#allocation3 + $0x1] }
 0x189   :  { %s1357_s7 = vpop.sfrf %1356 }
 0x18a   :  { %p1600_p11 = scmp.ne.s32.totalorder %s1357_s7, 0 }
 0x18c   :  { %1361 = shalt.err (%p1600_p11)  }

</bundles_post_ra>
